<compile_context>
chip_gen: v7x
topology: tpu7x:2x2x1
jax: 0.10.0
libtpu: 0.0.40
codegen_flags: <defaults>
</compile_context>

<pallas_src>
import math

import jax
import jax.numpy as jnp
from jax.experimental import pallas as pl
from jax.experimental.pallas import tpu as pltpu  # noqa: F401  (memory-space/VMEM utilities if scaled up)


# ----------------------------------------------------------------------------
# Fused kernel builder.  All shapes are static (closed over), so the time loop
# and the layer loop fully unroll at trace time.
# ----------------------------------------------------------------------------
def _make_fused_kernel(S, B, I, H, O, num_layers):
    def kernel(*refs):
        # refs layout:
        #   [x_flat,
        #    w_ih0, w_hh0, b0,
        #    (w_cat_l, b_l) for l in 1..L-1,
        #    fc_w, fc_b,
        #    out_ref]
        x_ref = refs[0]                          # (S*B, I)   f32
        w_ih0 = refs[1][...]                     # (I, 4H)    f32
        w_hh0 = refs[2][...]                     # (H, 4H)    bf16
        b0 = refs[3][...]                        # (1, 4H)    f32
        idx = 4
        cat_layers = []
        for _ in range(num_layers - 1):
            cat_layers.append((refs[idx][...],   # (2H, 4H)   bf16   [w_ih; w_hh]
                               refs[idx + 1][...]))  # (1, 4H) f32
            idx += 2
        fc_w = refs[idx][...]                    # (H, O)     f32
        fc_b = refs[idx + 1][...]                # (1, O)     f32
        out_ref = refs[idx + 2]                  # (B, O)     f32

        # Hoisted layer-0 input projection for ALL timesteps: one MXU call.
        # Kept in f32 for numerical parity (K = I is tiny, costs nothing).
        gates_x0 = jnp.dot(x_ref[...], w_ih0,
                           preferred_element_type=jnp.float32) + b0   # (S*B, 4H)
        # Pre-slice per-step rows right after the matmul; these slices have no
        # dependency on the recurrence so they sit off the critical path.
        gx0 = [gates_x0[t * B:(t + 1) * B, :] for t in range(S)]

        def cell(g_pre, c_prev):
            # Two full-(B,4H)-vreg EUP passes (sigmoid + tanh over the whole
            # gate vector) instead of four sub-vreg ones; elementwise math is
            # f32 on purpose (v5e VPU/EUP lack bf16).
            sig = jax.nn.sigmoid(g_pre)
            th = jnp.tanh(g_pre)
            i_g = sig[:, 0 * H:1 * H]
            f_g = sig[:, 1 * H:2 * H]
            g_g = th[:, 2 * H:3 * H]
            o_g = sig[:, 3 * H:4 * H]
            c_new = f_g * c_prev + i_g * g_g
            h_new = o_g * jnp.tanh(c_new)
            return h_new, c_new

        h = [jnp.zeros((B, H), jnp.float32) for _ in range(num_layers)]
        c = [jnp.zeros((B, H), jnp.float32) for _ in range(num_layers)]

        # Wavefront over (t, layer): within iteration t, layer l consumes the
        # freshly produced h of layer l-1.  Layer 0's step t+1 is independent
        # of layer 1's step t, so the unrolled trace exposes both halves of
        # each wavefront diagonal to the scheduler (critical path ~ S + L - 1).
        # TODO(synk): block-diagonal fusion of a whole diagonal into one matmul
        # and holding the recurrent RHS in MXU staging registers
        # (pltpu.matmul_push_rhs/acc_lhs/pop) are possible further wins;
        # verify with a bundle dump before adding that complexity.
        for t in range(S):
            # ---- layer 0: recurrent matmul only (input proj hoisted above).
            g0 = gx0[t] + jnp.dot(h[0].astype(jnp.bfloat16), w_hh0,
                                  preferred_element_type=jnp.float32)
            h[0], c[0] = cell(g0, c[0])
            below = h[0]
            # ---- layers >= 1: fused [input | recurrent] matmul, one MXU issue.
            # TODO(synk): nn.LSTM inter-layer Dropout(0.5) is identity in eval
            # mode; a training path would need pltpu.prng_* masking here.
            for l in range(1, num_layers):
                w_cat, b_l = cat_layers[l - 1]
                inp = jnp.concatenate([below.astype(jnp.bfloat16),
                                       h[l].astype(jnp.bfloat16)], axis=1)  # (B, 2H)
                g = jnp.dot(inp, w_cat, preferred_element_type=jnp.float32) + b_l
                h[l], c[l] = cell(g, c[l])
                below = h[l]

        # ---- Head: LeakyReLU -> Dropout(eval: identity) -> Linear -> Sigmoid.
        # TODO(synk): Dropout(0.5) after the LeakyReLU is a no-op in eval mode;
        # training-mode RNG masking not implemented.
        h_last = h[num_layers - 1]
        hh = jnp.where(h_last >= 0.0, h_last, jnp.float32(0.01) * h_last)
        y = jnp.dot(hh, fc_w, preferred_element_type=jnp.float32) + fc_b
        out_ref[...] = jax.nn.sigmoid(y)

    return kernel


# ----------------------------------------------------------------------------
# Full model forward (inference semantics, matches LSTMLinear.forward in eval).
# ----------------------------------------------------------------------------
@jax.jit
def lstm_linear_forward(x_seq, params):
    S, B, I = x_seq.shape
    H = params["w_hh0"].shape[0]
    O = params["fc_w"].shape[1]
    num_layers = 1 + len(params["w_cat"])

    # (S, B, I) -> (S*B, I): metadata-only reshape, no dtype conversion.
    x_flat = x_seq.reshape(S * B, I)

    flat_inputs = [x_flat, params["w_ih0"], params["w_hh0"], params["b0"]]
    for w_cat_l, b_l in zip(params["w_cat"], params["b"]):
        flat_inputs += [w_cat_l, b_l]
    flat_inputs += [params["fc_w"], params["fc_b"]]

    kernel = _make_fused_kernel(S, B, I, H, O, num_layers)

    # Single fused pallas_call, grid=(): all operands (< 100 KiB total) live in
    # VMEM; no scratch needed (inter-layer activations stay in vregs).
    # TODO(synk): for a non-trivial batch on v7x, add a batch-parallel grid
    # axis (dimension_semantics=("parallel",)) to occupy the 2nd TensorCore and
    # pad B to a multiple of 8; at B=2 the single-core version is the right
    # call.
    y = pl.pallas_call(
        kernel,
        out_shape=jax.ShapeDtypeStruct((B, O), jnp.float32),
    )(*flat_inputs)

    # torch.squeeze(out, 1): only squeezes if that dim is size 1.
    if y.ndim > 1 and y.shape[1] == 1:
        y = jnp.squeeze(y, axis=1)
    return y


# ----------------------------------------------------------------------------
# Parameter init (mirrors nn.LSTM / nn.Linear uniform(-1/sqrt(H), 1/sqrt(H))).
# Weights are stored pre-transposed and already in their kernel dtypes; LSTM
# biases pre-summed (b_ih + b_hh); layers >= 1 store the fused [w_ih; w_hh].
# ----------------------------------------------------------------------------
def init_params(key, input_size, hidden_size, num_layers, output_size):
    H = hidden_size
    k = 1.0 / math.sqrt(H)
    params = {"w_cat": [], "b": []}
    for layer in range(num_layers):
        in_dim = input_size if layer == 0 else H
        key, k1, k2, k3, k4 = jax.random.split(key, 5)
        w_ih = jax.random.uniform(k1, (4 * H, in_dim), jnp.float32, -k, k)
        w_hh = jax.random.uniform(k2, (4 * H, H), jnp.float32, -k, k)
        b_ih = jax.random.uniform(k3, (4 * H,), jnp.float32, -k, k)
        b_hh = jax.random.uniform(k4, (4 * H,), jnp.float32, -k, k)
        b = (b_ih + b_hh).reshape(1, 4 * H)
        if layer == 0:
            params["w_ih0"] = w_ih.T                          # (I, 4H)  f32
            params["w_hh0"] = w_hh.T.astype(jnp.bfloat16)     # (H, 4H)  bf16
            params["b0"] = b                                  # (1, 4H)  f32
        else:
            params["w_cat"].append(
                jnp.concatenate([w_ih.T, w_hh.T], axis=0).astype(jnp.bfloat16)
            )                                                 # (2H, 4H) bf16
            params["b"].append(b)                             # (1, 4H)  f32
    key, k5, k6 = jax.random.split(key, 3)
    w_fc = jax.random.uniform(k5, (output_size, H), jnp.float32, -k, k)
    b_fc = jax.random.uniform(k6, (output_size,), jnp.float32, -k, k)
    params["fc_w"] = w_fc.T                                   # (H, O)   f32
    params["fc_b"] = b_fc.reshape(1, output_size)             # (1, O)   f32
    return params


if __name__ == "__main__":
    input_size = 4
    hidden_size = 32
    num_layers = 2
    output_size = 1
    seq_len = 8
    batch = 2

    key = jax.random.PRNGKey(0)
    key, kx = jax.random.split(key)
    # x: (seq_len, batch, input_size) -- PyTorch nn.LSTM default layout.
    x = jax.random.normal(kx, (seq_len, batch, input_size), dtype=jnp.float32)
    # TODO(synk): StandardScaler is stored on the module but never used in
    # forward(); omitted.

    params = init_params(key, input_size, hidden_size, num_layers, output_size)

    y = lstm_linear_forward(x, params)
    jax.block_until_ready(y)
    assert y.shape == (batch,), y.shape
    assert bool(jnp.all(jnp.isfinite(y)))
    print("KERNEL_OK")
</pallas_src>

<mosaic_0001>
module attributes {stable_mosaic.version = 11 : i64} {
  func.func @kernel(%arg0: memref<16x4xf32, #tpu.memory_space<vmem>>, %arg1: memref<4x128xf32, #tpu.memory_space<vmem>>, %arg2: memref<32x128xbf16, #tpu.memory_space<vmem>>, %arg3: memref<1x128xf32, #tpu.memory_space<vmem>>, %arg4: memref<64x128xbf16, #tpu.memory_space<vmem>>, %arg5: memref<1x128xf32, #tpu.memory_space<vmem>>, %arg6: memref<32x1xf32, #tpu.memory_space<vmem>>, %arg7: memref<1x1xf32, #tpu.memory_space<vmem>>, %arg8: memref<2x1xf32, #tpu.memory_space<vmem>>) attributes {dimension_semantics = [], scalar_prefetch = 0 : i64, scratch_operands = 0 : i64, tpu.core_type = #tpu.core_type<tc>} {
    %c0 = arith.constant 0 : index
    %c0_0 = arith.constant 0 : index
    %0 = vector.load %arg1[%c0, %c0_0] : memref<4x128xf32, #tpu.memory_space<vmem>>, vector<4x128xf32>
    %c0_1 = arith.constant 0 : index
    %c0_2 = arith.constant 0 : index
    %1 = vector.load %arg2[%c0_1, %c0_2] : memref<32x128xbf16, #tpu.memory_space<vmem>>, vector<32x128xbf16>
    %c0_3 = arith.constant 0 : index
    %c0_4 = arith.constant 0 : index
    %2 = vector.load %arg3[%c0_3, %c0_4] : memref<1x128xf32, #tpu.memory_space<vmem>>, vector<1x128xf32>
    %c0_5 = arith.constant 0 : index
    %c0_6 = arith.constant 0 : index
    %3 = vector.load %arg4[%c0_5, %c0_6] : memref<64x128xbf16, #tpu.memory_space<vmem>>, vector<64x128xbf16>
    %c0_7 = arith.constant 0 : index
    %c0_8 = arith.constant 0 : index
    %4 = vector.load %arg5[%c0_7, %c0_8] : memref<1x128xf32, #tpu.memory_space<vmem>>, vector<1x128xf32>
    %c0_9 = arith.constant 0 : index
    %c0_10 = arith.constant 0 : index
    %5 = vector.load %arg6[%c0_9, %c0_10] : memref<32x1xf32, #tpu.memory_space<vmem>>, vector<32x1xf32>
    %c0_11 = arith.constant 0 : index
    %c0_12 = arith.constant 0 : index
    %6 = vector.load %arg7[%c0_11, %c0_12] : memref<1x1xf32, #tpu.memory_space<vmem>>, vector<1x1xf32>
    %c0_13 = arith.constant 0 : index
    %c0_14 = arith.constant 0 : index
    %7 = vector.load %arg0[%c0_13, %c0_14] : memref<16x4xf32, #tpu.memory_space<vmem>>, vector<16x4xf32>
    %cst = arith.constant dense<0.000000e+00> : vector<16x128xf32>
    %8 = tpu.matmul %7, %0, %cst {dimension_numbers = #tpu.dot_dimension_numbers<[1], [0], [0], [1], [0, 0, 1, 1], [], []>} : vector<16x4xf32>, vector<4x128xf32>, vector<16x128xf32> -> vector<16x128xf32>
    %9 = vector.broadcast %2 : vector<1x128xf32> to vector<16x128xf32>
    %10 = arith.addf %8, %9 : vector<16x128xf32>
    %11 = vector.extract_strided_slice %10 {offsets = [0, 0], sizes = [2, 128], strides = [1, 1]} : vector<16x128xf32> to vector<2x128xf32>
    %12 = vector.extract_strided_slice %10 {offsets = [2, 0], sizes = [2, 128], strides = [1, 1]} : vector<16x128xf32> to vector<2x128xf32>
    %13 = vector.extract_strided_slice %10 {offsets = [4, 0], sizes = [2, 128], strides = [1, 1]} : vector<16x128xf32> to vector<2x128xf32>
    %14 = vector.extract_strided_slice %10 {offsets = [6, 0], sizes = [2, 128], strides = [1, 1]} : vector<16x128xf32> to vector<2x128xf32>
    %15 = vector.extract_strided_slice %10 {offsets = [8, 0], sizes = [2, 128], strides = [1, 1]} : vector<16x128xf32> to vector<2x128xf32>
    %16 = vector.extract_strided_slice %10 {offsets = [10, 0], sizes = [2, 128], strides = [1, 1]} : vector<16x128xf32> to vector<2x128xf32>
    %17 = vector.extract_strided_slice %10 {offsets = [12, 0], sizes = [2, 128], strides = [1, 1]} : vector<16x128xf32> to vector<2x128xf32>
    %18 = vector.extract_strided_slice %10 {offsets = [14, 0], sizes = [2, 128], strides = [1, 1]} : vector<16x128xf32> to vector<2x128xf32>
    %cst_15 = arith.constant 0.000000e+00 : f32
    %19 = vector.broadcast %cst_15 : f32 to vector<2x32xf32>
    %cst_16 = arith.constant 0.000000e+00 : f32
    %20 = vector.broadcast %cst_16 : f32 to vector<2x32xf32>
    %cst_17 = arith.constant 0.000000e+00 : f32
    %21 = vector.broadcast %cst_17 : f32 to vector<2x32xf32>
    %cst_18 = arith.constant 0.000000e+00 : f32
    %22 = vector.broadcast %cst_18 : f32 to vector<2x32xf32>
    %23 = arith.truncf %19 : vector<2x32xf32> to vector<2x32xbf16>
    %cst_19 = arith.constant dense<0.000000e+00> : vector<2x128xf32>
    %24 = tpu.matmul %23, %1, %cst_19 {dimension_numbers = #tpu.dot_dimension_numbers<[1], [0], [0], [1], [0, 0, 1, 1], [], []>} : vector<2x32xbf16>, vector<32x128xbf16>, vector<2x128xf32> -> vector<2x128xf32>
    %25 = arith.addf %11, %24 : vector<2x128xf32>
    %26 = arith.negf %25 : vector<2x128xf32>
    %27 = math.exp %26 : vector<2x128xf32>
    %cst_20 = arith.constant 1.000000e+00 : f32
    %28 = vector.broadcast %cst_20 : f32 to vector<2x128xf32>
    %29 = arith.addf %28, %27 : vector<2x128xf32>
    %30 = arith.divf %28, %29 : vector<2x128xf32>
    %31 = math.tanh %25 : vector<2x128xf32>
    %32 = vector.extract_strided_slice %30 {offsets = [0, 0], sizes = [2, 32], strides = [1, 1]} : vector<2x128xf32> to vector<2x32xf32>
    %33 = vector.extract_strided_slice %30 {offsets = [0, 32], sizes = [2, 32], strides = [1, 1]} : vector<2x128xf32> to vector<2x32xf32>
    %34 = vector.extract_strided_slice %31 {offsets = [0, 64], sizes = [2, 32], strides = [1, 1]} : vector<2x128xf32> to vector<2x32xf32>
    %35 = vector.extract_strided_slice %30 {offsets = [0, 96], sizes = [2, 32], strides = [1, 1]} : vector<2x128xf32> to vector<2x32xf32>
    %36 = arith.mulf %33, %21 : vector<2x32xf32>
    %37 = arith.mulf %32, %34 : vector<2x32xf32>
    %38 = arith.addf %36, %37 : vector<2x32xf32>
    %39 = math.tanh %38 : vector<2x32xf32>
    %40 = arith.mulf %35, %39 : vector<2x32xf32>
    %41 = arith.truncf %40 : vector<2x32xf32> to vector<2x32xbf16>
    %42 = arith.truncf %20 : vector<2x32xf32> to vector<2x32xbf16>
    %43 = tpu.concatenate %41, %42 in 1 : vector<2x32xbf16>, vector<2x32xbf16> -> vector<2x64xbf16>
    %cst_21 = arith.constant dense<0.000000e+00> : vector<2x128xf32>
    %44 = tpu.matmul %43, %3, %cst_21 {dimension_numbers = #tpu.dot_dimension_numbers<[1], [0], [0], [1], [0, 0, 1, 1], [], []>} : vector<2x64xbf16>, vector<64x128xbf16>, vector<2x128xf32> -> vector<2x128xf32>
    %45 = vector.broadcast %4 : vector<1x128xf32> to vector<2x128xf32>
    %46 = arith.addf %44, %45 : vector<2x128xf32>
    %47 = arith.negf %46 : vector<2x128xf32>
    %48 = math.exp %47 : vector<2x128xf32>
    %cst_22 = arith.constant 1.000000e+00 : f32
    %49 = vector.broadcast %cst_22 : f32 to vector<2x128xf32>
    %50 = arith.addf %49, %48 : vector<2x128xf32>
    %51 = arith.divf %49, %50 : vector<2x128xf32>
    %52 = math.tanh %46 : vector<2x128xf32>
    %53 = vector.extract_strided_slice %51 {offsets = [0, 0], sizes = [2, 32], strides = [1, 1]} : vector<2x128xf32> to vector<2x32xf32>
    %54 = vector.extract_strided_slice %51 {offsets = [0, 32], sizes = [2, 32], strides = [1, 1]} : vector<2x128xf32> to vector<2x32xf32>
    %55 = vector.extract_strided_slice %52 {offsets = [0, 64], sizes = [2, 32], strides = [1, 1]} : vector<2x128xf32> to vector<2x32xf32>
    %56 = vector.extract_strided_slice %51 {offsets = [0, 96], sizes = [2, 32], strides = [1, 1]} : vector<2x128xf32> to vector<2x32xf32>
    %57 = arith.mulf %54, %22 : vector<2x32xf32>
    %58 = arith.mulf %53, %55 : vector<2x32xf32>
    %59 = arith.addf %57, %58 : vector<2x32xf32>
    %60 = math.tanh %59 : vector<2x32xf32>
    %61 = arith.mulf %56, %60 : vector<2x32xf32>
    %62 = arith.truncf %40 : vector<2x32xf32> to vector<2x32xbf16>
    %cst_23 = arith.constant dense<0.000000e+00> : vector<2x128xf32>
    %63 = tpu.matmul %62, %1, %cst_23 {dimension_numbers = #tpu.dot_dimension_numbers<[1], [0], [0], [1], [0, 0, 1, 1], [], []>} : vector<2x32xbf16>, vector<32x128xbf16>, vector<2x128xf32> -> vector<2x128xf32>
    %64 = arith.addf %12, %63 : vector<2x128xf32>
    %65 = arith.negf %64 : vector<2x128xf32>
    %66 = math.exp %65 : vector<2x128xf32>
    %cst_24 = arith.constant 1.000000e+00 : f32
    %67 = vector.broadcast %cst_24 : f32 to vector<2x128xf32>
    %68 = arith.addf %67, %66 : vector<2x128xf32>
    %69 = arith.divf %67, %68 : vector<2x128xf32>
    %70 = math.tanh %64 : vector<2x128xf32>
    %71 = vector.extract_strided_slice %69 {offsets = [0, 0], sizes = [2, 32], strides = [1, 1]} : vector<2x128xf32> to vector<2x32xf32>
    %72 = vector.extract_strided_slice %69 {offsets = [0, 32], sizes = [2, 32], strides = [1, 1]} : vector<2x128xf32> to vector<2x32xf32>
    %73 = vector.extract_strided_slice %70 {offsets = [0, 64], sizes = [2, 32], strides = [1, 1]} : vector<2x128xf32> to vector<2x32xf32>
    %74 = vector.extract_strided_slice %69 {offsets = [0, 96], sizes = [2, 32], strides = [1, 1]} : vector<2x128xf32> to vector<2x32xf32>
    %75 = arith.mulf %72, %38 : vector<2x32xf32>
    %76 = arith.mulf %71, %73 : vector<2x32xf32>
    %77 = arith.addf %75, %76 : vector<2x32xf32>
    %78 = math.tanh %77 : vector<2x32xf32>
    %79 = arith.mulf %74, %78 : vector<2x32xf32>
    %80 = arith.truncf %79 : vector<2x32xf32> to vector<2x32xbf16>
    %81 = arith.truncf %61 : vector<2x32xf32> to vector<2x32xbf16>
    %82 = tpu.concatenate %80, %81 in 1 : vector<2x32xbf16>, vector<2x32xbf16> -> vector<2x64xbf16>
    %cst_25 = arith.constant dense<0.000000e+00> : vector<2x128xf32>
    %83 = tpu.matmul %82, %3, %cst_25 {dimension_numbers = #tpu.dot_dimension_numbers<[1], [0], [0], [1], [0, 0, 1, 1], [], []>} : vector<2x64xbf16>, vector<64x128xbf16>, vector<2x128xf32> -> vector<2x128xf32>
    %84 = vector.broadcast %4 : vector<1x128xf32> to vector<2x128xf32>
    %85 = arith.addf %83, %84 : vector<2x128xf32>
    %86 = arith.negf %85 : vector<2x128xf32>
    %87 = math.exp %86 : vector<2x128xf32>
    %cst_26 = arith.constant 1.000000e+00 : f32
    %88 = vector.broadcast %cst_26 : f32 to vector<2x128xf32>
    %89 = arith.addf %88, %87 : vector<2x128xf32>
    %90 = arith.divf %88, %89 : vector<2x128xf32>
    %91 = math.tanh %85 : vector<2x128xf32>
    %92 = vector.extract_strided_slice %90 {offsets = [0, 0], sizes = [2, 32], strides = [1, 1]} : vector<2x128xf32> to vector<2x32xf32>
    %93 = vector.extract_strided_slice %90 {offsets = [0, 32], sizes = [2, 32], strides = [1, 1]} : vector<2x128xf32> to vector<2x32xf32>
    %94 = vector.extract_strided_slice %91 {offsets = [0, 64], sizes = [2, 32], strides = [1, 1]} : vector<2x128xf32> to vector<2x32xf32>
    %95 = vector.extract_strided_slice %90 {offsets = [0, 96], sizes = [2, 32], strides = [1, 1]} : vector<2x128xf32> to vector<2x32xf32>
    %96 = arith.mulf %93, %59 : vector<2x32xf32>
    %97 = arith.mulf %92, %94 : vector<2x32xf32>
    %98 = arith.addf %96, %97 : vector<2x32xf32>
    %99 = math.tanh %98 : vector<2x32xf32>
    %100 = arith.mulf %95, %99 : vector<2x32xf32>
    %101 = arith.truncf %79 : vector<2x32xf32> to vector<2x32xbf16>
    %cst_27 = arith.constant dense<0.000000e+00> : vector<2x128xf32>
    %102 = tpu.matmul %101, %1, %cst_27 {dimension_numbers = #tpu.dot_dimension_numbers<[1], [0], [0], [1], [0, 0, 1, 1], [], []>} : vector<2x32xbf16>, vector<32x128xbf16>, vector<2x128xf32> -> vector<2x128xf32>
    %103 = arith.addf %13, %102 : vector<2x128xf32>
    %104 = arith.negf %103 : vector<2x128xf32>
    %105 = math.exp %104 : vector<2x128xf32>
    %cst_28 = arith.constant 1.000000e+00 : f32
    %106 = vector.broadcast %cst_28 : f32 to vector<2x128xf32>
    %107 = arith.addf %106, %105 : vector<2x128xf32>
    %108 = arith.divf %106, %107 : vector<2x128xf32>
    %109 = math.tanh %103 : vector<2x128xf32>
    %110 = vector.extract_strided_slice %108 {offsets = [0, 0], sizes = [2, 32], strides = [1, 1]} : vector<2x128xf32> to vector<2x32xf32>
    %111 = vector.extract_strided_slice %108 {offsets = [0, 32], sizes = [2, 32], strides = [1, 1]} : vector<2x128xf32> to vector<2x32xf32>
    %112 = vector.extract_strided_slice %109 {offsets = [0, 64], sizes = [2, 32], strides = [1, 1]} : vector<2x128xf32> to vector<2x32xf32>
    %113 = vector.extract_strided_slice %108 {offsets = [0, 96], sizes = [2, 32], strides = [1, 1]} : vector<2x128xf32> to vector<2x32xf32>
    %114 = arith.mulf %111, %77 : vector<2x32xf32>
    %115 = arith.mulf %110, %112 : vector<2x32xf32>
    %116 = arith.addf %114, %115 : vector<2x32xf32>
    %117 = math.tanh %116 : vector<2x32xf32>
    %118 = arith.mulf %113, %117 : vector<2x32xf32>
    %119 = arith.truncf %118 : vector<2x32xf32> to vector<2x32xbf16>
    %120 = arith.truncf %100 : vector<2x32xf32> to vector<2x32xbf16>
    %121 = tpu.concatenate %119, %120 in 1 : vector<2x32xbf16>, vector<2x32xbf16> -> vector<2x64xbf16>
    %cst_29 = arith.constant dense<0.000000e+00> : vector<2x128xf32>
    %122 = tpu.matmul %121, %3, %cst_29 {dimension_numbers = #tpu.dot_dimension_numbers<[1], [0], [0], [1], [0, 0, 1, 1], [], []>} : vector<2x64xbf16>, vector<64x128xbf16>, vector<2x128xf32> -> vector<2x128xf32>
    %123 = vector.broadcast %4 : vector<1x128xf32> to vector<2x128xf32>
    %124 = arith.addf %122, %123 : vector<2x128xf32>
    %125 = arith.negf %124 : vector<2x128xf32>
    %126 = math.exp %125 : vector<2x128xf32>
    %cst_30 = arith.constant 1.000000e+00 : f32
    %127 = vector.broadcast %cst_30 : f32 to vector<2x128xf32>
    %128 = arith.addf %127, %126 : vector<2x128xf32>
    %129 = arith.divf %127, %128 : vector<2x128xf32>
    %130 = math.tanh %124 : vector<2x128xf32>
    %131 = vector.extract_strided_slice %129 {offsets = [0, 0], sizes = [2, 32], strides = [1, 1]} : vector<2x128xf32> to vector<2x32xf32>
    %132 = vector.extract_strided_slice %129 {offsets = [0, 32], sizes = [2, 32], strides = [1, 1]} : vector<2x128xf32> to vector<2x32xf32>
    %133 = vector.extract_strided_slice %130 {offsets = [0, 64], sizes = [2, 32], strides = [1, 1]} : vector<2x128xf32> to vector<2x32xf32>
    %134 = vector.extract_strided_slice %129 {offsets = [0, 96], sizes = [2, 32], strides = [1, 1]} : vector<2x128xf32> to vector<2x32xf32>
    %135 = arith.mulf %132, %98 : vector<2x32xf32>
    %136 = arith.mulf %131, %133 : vector<2x32xf32>
    %137 = arith.addf %135, %136 : vector<2x32xf32>
    %138 = math.tanh %137 : vector<2x32xf32>
    %139 = arith.mulf %134, %138 : vector<2x32xf32>
    %140 = arith.truncf %118 : vector<2x32xf32> to vector<2x32xbf16>
    %cst_31 = arith.constant dense<0.000000e+00> : vector<2x128xf32>
    %141 = tpu.matmul %140, %1, %cst_31 {dimension_numbers = #tpu.dot_dimension_numbers<[1], [0], [0], [1], [0, 0, 1, 1], [], []>} : vector<2x32xbf16>, vector<32x128xbf16>, vector<2x128xf32> -> vector<2x128xf32>
    %142 = arith.addf %14, %141 : vector<2x128xf32>
    %143 = arith.negf %142 : vector<2x128xf32>
    %144 = math.exp %143 : vector<2x128xf32>
    %cst_32 = arith.constant 1.000000e+00 : f32
    %145 = vector.broadcast %cst_32 : f32 to vector<2x128xf32>
    %146 = arith.addf %145, %144 : vector<2x128xf32>
    %147 = arith.divf %145, %146 : vector<2x128xf32>
    %148 = math.tanh %142 : vector<2x128xf32>
    %149 = vector.extract_strided_slice %147 {offsets = [0, 0], sizes = [2, 32], strides = [1, 1]} : vector<2x128xf32> to vector<2x32xf32>
    %150 = vector.extract_strided_slice %147 {offsets = [0, 32], sizes = [2, 32], strides = [1, 1]} : vector<2x128xf32> to vector<2x32xf32>
    %151 = vector.extract_strided_slice %148 {offsets = [0, 64], sizes = [2, 32], strides = [1, 1]} : vector<2x128xf32> to vector<2x32xf32>
    %152 = vector.extract_strided_slice %147 {offsets = [0, 96], sizes = [2, 32], strides = [1, 1]} : vector<2x128xf32> to vector<2x32xf32>
    %153 = arith.mulf %150, %116 : vector<2x32xf32>
    %154 = arith.mulf %149, %151 : vector<2x32xf32>
    %155 = arith.addf %153, %154 : vector<2x32xf32>
    %156 = math.tanh %155 : vector<2x32xf32>
    %157 = arith.mulf %152, %156 : vector<2x32xf32>
    %158 = arith.truncf %157 : vector<2x32xf32> to vector<2x32xbf16>
    %159 = arith.truncf %139 : vector<2x32xf32> to vector<2x32xbf16>
    %160 = tpu.concatenate %158, %159 in 1 : vector<2x32xbf16>, vector<2x32xbf16> -> vector<2x64xbf16>
    %cst_33 = arith.constant dense<0.000000e+00> : vector<2x128xf32>
    %161 = tpu.matmul %160, %3, %cst_33 {dimension_numbers = #tpu.dot_dimension_numbers<[1], [0], [0], [1], [0, 0, 1, 1], [], []>} : vector<2x64xbf16>, vector<64x128xbf16>, vector<2x128xf32> -> vector<2x128xf32>
    %162 = vector.broadcast %4 : vector<1x128xf32> to vector<2x128xf32>
    %163 = arith.addf %161, %162 : vector<2x128xf32>
    %164 = arith.negf %163 : vector<2x128xf32>
    %165 = math.exp %164 : vector<2x128xf32>
    %cst_34 = arith.constant 1.000000e+00 : f32
    %166 = vector.broadcast %cst_34 : f32 to vector<2x128xf32>
    %167 = arith.addf %166, %165 : vector<2x128xf32>
    %168 = arith.divf %166, %167 : vector<2x128xf32>
    %169 = math.tanh %163 : vector<2x128xf32>
    %170 = vector.extract_strided_slice %168 {offsets = [0, 0], sizes = [2, 32], strides = [1, 1]} : vector<2x128xf32> to vector<2x32xf32>
    %171 = vector.extract_strided_slice %168 {offsets = [0, 32], sizes = [2, 32], strides = [1, 1]} : vector<2x128xf32> to vector<2x32xf32>
    %172 = vector.extract_strided_slice %169 {offsets = [0, 64], sizes = [2, 32], strides = [1, 1]} : vector<2x128xf32> to vector<2x32xf32>
    %173 = vector.extract_strided_slice %168 {offsets = [0, 96], sizes = [2, 32], strides = [1, 1]} : vector<2x128xf32> to vector<2x32xf32>
    %174 = arith.mulf %171, %137 : vector<2x32xf32>
    %175 = arith.mulf %170, %172 : vector<2x32xf32>
    %176 = arith.addf %174, %175 : vector<2x32xf32>
    %177 = math.tanh %176 : vector<2x32xf32>
    %178 = arith.mulf %173, %177 : vector<2x32xf32>
    %179 = arith.truncf %157 : vector<2x32xf32> to vector<2x32xbf16>
    %cst_35 = arith.constant dense<0.000000e+00> : vector<2x128xf32>
    %180 = tpu.matmul %179, %1, %cst_35 {dimension_numbers = #tpu.dot_dimension_numbers<[1], [0], [0], [1], [0, 0, 1, 1], [], []>} : vector<2x32xbf16>, vector<32x128xbf16>, vector<2x128xf32> -> vector<2x128xf32>
    %181 = arith.addf %15, %180 : vector<2x128xf32>
    %182 = arith.negf %181 : vector<2x128xf32>
    %183 = math.exp %182 : vector<2x128xf32>
    %cst_36 = arith.constant 1.000000e+00 : f32
    %184 = vector.broadcast %cst_36 : f32 to vector<2x128xf32>
    %185 = arith.addf %184, %183 : vector<2x128xf32>
    %186 = arith.divf %184, %185 : vector<2x128xf32>
    %187 = math.tanh %181 : vector<2x128xf32>
    %188 = vector.extract_strided_slice %186 {offsets = [0, 0], sizes = [2, 32], strides = [1, 1]} : vector<2x128xf32> to vector<2x32xf32>
    %189 = vector.extract_strided_slice %186 {offsets = [0, 32], sizes = [2, 32], strides = [1, 1]} : vector<2x128xf32> to vector<2x32xf32>
    %190 = vector.extract_strided_slice %187 {offsets = [0, 64], sizes = [2, 32], strides = [1, 1]} : vector<2x128xf32> to vector<2x32xf32>
    %191 = vector.extract_strided_slice %186 {offsets = [0, 96], sizes = [2, 32], strides = [1, 1]} : vector<2x128xf32> to vector<2x32xf32>
    %192 = arith.mulf %189, %155 : vector<2x32xf32>
    %193 = arith.mulf %188, %190 : vector<2x32xf32>
    %194 = arith.addf %192, %193 : vector<2x32xf32>
    %195 = math.tanh %194 : vector<2x32xf32>
    %196 = arith.mulf %191, %195 : vector<2x32xf32>
    %197 = arith.truncf %196 : vector<2x32xf32> to vector<2x32xbf16>
    %198 = arith.truncf %178 : vector<2x32xf32> to vector<2x32xbf16>
    %199 = tpu.concatenate %197, %198 in 1 : vector<2x32xbf16>, vector<2x32xbf16> -> vector<2x64xbf16>
    %cst_37 = arith.constant dense<0.000000e+00> : vector<2x128xf32>
    %200 = tpu.matmul %199, %3, %cst_37 {dimension_numbers = #tpu.dot_dimension_numbers<[1], [0], [0], [1], [0, 0, 1, 1], [], []>} : vector<2x64xbf16>, vector<64x128xbf16>, vector<2x128xf32> -> vector<2x128xf32>
    %201 = vector.broadcast %4 : vector<1x128xf32> to vector<2x128xf32>
    %202 = arith.addf %200, %201 : vector<2x128xf32>
    %203 = arith.negf %202 : vector<2x128xf32>
    %204 = math.exp %203 : vector<2x128xf32>
    %cst_38 = arith.constant 1.000000e+00 : f32
    %205 = vector.broadcast %cst_38 : f32 to vector<2x128xf32>
    %206 = arith.addf %205, %204 : vector<2x128xf32>
    %207 = arith.divf %205, %206 : vector<2x128xf32>
    %208 = math.tanh %202 : vector<2x128xf32>
    %209 = vector.extract_strided_slice %207 {offsets = [0, 0], sizes = [2, 32], strides = [1, 1]} : vector<2x128xf32> to vector<2x32xf32>
    %210 = vector.extract_strided_slice %207 {offsets = [0, 32], sizes = [2, 32], strides = [1, 1]} : vector<2x128xf32> to vector<2x32xf32>
    %211 = vector.extract_strided_slice %208 {offsets = [0, 64], sizes = [2, 32], strides = [1, 1]} : vector<2x128xf32> to vector<2x32xf32>
    %212 = vector.extract_strided_slice %207 {offsets = [0, 96], sizes = [2, 32], strides = [1, 1]} : vector<2x128xf32> to vector<2x32xf32>
    %213 = arith.mulf %210, %176 : vector<2x32xf32>
    %214 = arith.mulf %209, %211 : vector<2x32xf32>
    %215 = arith.addf %213, %214 : vector<2x32xf32>
    %216 = math.tanh %215 : vector<2x32xf32>
    %217 = arith.mulf %212, %216 : vector<2x32xf32>
    %218 = arith.truncf %196 : vector<2x32xf32> to vector<2x32xbf16>
    %cst_39 = arith.constant dense<0.000000e+00> : vector<2x128xf32>
    %219 = tpu.matmul %218, %1, %cst_39 {dimension_numbers = #tpu.dot_dimension_numbers<[1], [0], [0], [1], [0, 0, 1, 1], [], []>} : vector<2x32xbf16>, vector<32x128xbf16>, vector<2x128xf32> -> vector<2x128xf32>
    %220 = arith.addf %16, %219 : vector<2x128xf32>
    %221 = arith.negf %220 : vector<2x128xf32>
    %222 = math.exp %221 : vector<2x128xf32>
    %cst_40 = arith.constant 1.000000e+00 : f32
    %223 = vector.broadcast %cst_40 : f32 to vector<2x128xf32>
    %224 = arith.addf %223, %222 : vector<2x128xf32>
    %225 = arith.divf %223, %224 : vector<2x128xf32>
    %226 = math.tanh %220 : vector<2x128xf32>
    %227 = vector.extract_strided_slice %225 {offsets = [0, 0], sizes = [2, 32], strides = [1, 1]} : vector<2x128xf32> to vector<2x32xf32>
    %228 = vector.extract_strided_slice %225 {offsets = [0, 32], sizes = [2, 32], strides = [1, 1]} : vector<2x128xf32> to vector<2x32xf32>
    %229 = vector.extract_strided_slice %226 {offsets = [0, 64], sizes = [2, 32], strides = [1, 1]} : vector<2x128xf32> to vector<2x32xf32>
    %230 = vector.extract_strided_slice %225 {offsets = [0, 96], sizes = [2, 32], strides = [1, 1]} : vector<2x128xf32> to vector<2x32xf32>
    %231 = arith.mulf %228, %194 : vector<2x32xf32>
    %232 = arith.mulf %227, %229 : vector<2x32xf32>
    %233 = arith.addf %231, %232 : vector<2x32xf32>
    %234 = math.tanh %233 : vector<2x32xf32>
    %235 = arith.mulf %230, %234 : vector<2x32xf32>
    %236 = arith.truncf %235 : vector<2x32xf32> to vector<2x32xbf16>
    %237 = arith.truncf %217 : vector<2x32xf32> to vector<2x32xbf16>
    %238 = tpu.concatenate %236, %237 in 1 : vector<2x32xbf16>, vector<2x32xbf16> -> vector<2x64xbf16>
    %cst_41 = arith.constant dense<0.000000e+00> : vector<2x128xf32>
    %239 = tpu.matmul %238, %3, %cst_41 {dimension_numbers = #tpu.dot_dimension_numbers<[1], [0], [0], [1], [0, 0, 1, 1], [], []>} : vector<2x64xbf16>, vector<64x128xbf16>, vector<2x128xf32> -> vector<2x128xf32>
    %240 = vector.broadcast %4 : vector<1x128xf32> to vector<2x128xf32>
    %241 = arith.addf %239, %240 : vector<2x128xf32>
    %242 = arith.negf %241 : vector<2x128xf32>
    %243 = math.exp %242 : vector<2x128xf32>
    %cst_42 = arith.constant 1.000000e+00 : f32
    %244 = vector.broadcast %cst_42 : f32 to vector<2x128xf32>
    %245 = arith.addf %244, %243 : vector<2x128xf32>
    %246 = arith.divf %244, %245 : vector<2x128xf32>
    %247 = math.tanh %241 : vector<2x128xf32>
    %248 = vector.extract_strided_slice %246 {offsets = [0, 0], sizes = [2, 32], strides = [1, 1]} : vector<2x128xf32> to vector<2x32xf32>
    %249 = vector.extract_strided_slice %246 {offsets = [0, 32], sizes = [2, 32], strides = [1, 1]} : vector<2x128xf32> to vector<2x32xf32>
    %250 = vector.extract_strided_slice %247 {offsets = [0, 64], sizes = [2, 32], strides = [1, 1]} : vector<2x128xf32> to vector<2x32xf32>
    %251 = vector.extract_strided_slice %246 {offsets = [0, 96], sizes = [2, 32], strides = [1, 1]} : vector<2x128xf32> to vector<2x32xf32>
    %252 = arith.mulf %249, %215 : vector<2x32xf32>
    %253 = arith.mulf %248, %250 : vector<2x32xf32>
    %254 = arith.addf %252, %253 : vector<2x32xf32>
    %255 = math.tanh %254 : vector<2x32xf32>
    %256 = arith.mulf %251, %255 : vector<2x32xf32>
    %257 = arith.truncf %235 : vector<2x32xf32> to vector<2x32xbf16>
    %cst_43 = arith.constant dense<0.000000e+00> : vector<2x128xf32>
    %258 = tpu.matmul %257, %1, %cst_43 {dimension_numbers = #tpu.dot_dimension_numbers<[1], [0], [0], [1], [0, 0, 1, 1], [], []>} : vector<2x32xbf16>, vector<32x128xbf16>, vector<2x128xf32> -> vector<2x128xf32>
    %259 = arith.addf %17, %258 : vector<2x128xf32>
    %260 = arith.negf %259 : vector<2x128xf32>
    %261 = math.exp %260 : vector<2x128xf32>
    %cst_44 = arith.constant 1.000000e+00 : f32
    %262 = vector.broadcast %cst_44 : f32 to vector<2x128xf32>
    %263 = arith.addf %262, %261 : vector<2x128xf32>
    %264 = arith.divf %262, %263 : vector<2x128xf32>
    %265 = math.tanh %259 : vector<2x128xf32>
    %266 = vector.extract_strided_slice %264 {offsets = [0, 0], sizes = [2, 32], strides = [1, 1]} : vector<2x128xf32> to vector<2x32xf32>
    %267 = vector.extract_strided_slice %264 {offsets = [0, 32], sizes = [2, 32], strides = [1, 1]} : vector<2x128xf32> to vector<2x32xf32>
    %268 = vector.extract_strided_slice %265 {offsets = [0, 64], sizes = [2, 32], strides = [1, 1]} : vector<2x128xf32> to vector<2x32xf32>
    %269 = vector.extract_strided_slice %264 {offsets = [0, 96], sizes = [2, 32], strides = [1, 1]} : vector<2x128xf32> to vector<2x32xf32>
    %270 = arith.mulf %267, %233 : vector<2x32xf32>
    %271 = arith.mulf %266, %268 : vector<2x32xf32>
    %272 = arith.addf %270, %271 : vector<2x32xf32>
    %273 = math.tanh %272 : vector<2x32xf32>
    %274 = arith.mulf %269, %273 : vector<2x32xf32>
    %275 = arith.truncf %274 : vector<2x32xf32> to vector<2x32xbf16>
    %276 = arith.truncf %256 : vector<2x32xf32> to vector<2x32xbf16>
    %277 = tpu.concatenate %275, %276 in 1 : vector<2x32xbf16>, vector<2x32xbf16> -> vector<2x64xbf16>
    %cst_45 = arith.constant dense<0.000000e+00> : vector<2x128xf32>
    %278 = tpu.matmul %277, %3, %cst_45 {dimension_numbers = #tpu.dot_dimension_numbers<[1], [0], [0], [1], [0, 0, 1, 1], [], []>} : vector<2x64xbf16>, vector<64x128xbf16>, vector<2x128xf32> -> vector<2x128xf32>
    %279 = vector.broadcast %4 : vector<1x128xf32> to vector<2x128xf32>
    %280 = arith.addf %278, %279 : vector<2x128xf32>
    %281 = arith.negf %280 : vector<2x128xf32>
    %282 = math.exp %281 : vector<2x128xf32>
    %cst_46 = arith.constant 1.000000e+00 : f32
    %283 = vector.broadcast %cst_46 : f32 to vector<2x128xf32>
    %284 = arith.addf %283, %282 : vector<2x128xf32>
    %285 = arith.divf %283, %284 : vector<2x128xf32>
    %286 = math.tanh %280 : vector<2x128xf32>
    %287 = vector.extract_strided_slice %285 {offsets = [0, 0], sizes = [2, 32], strides = [1, 1]} : vector<2x128xf32> to vector<2x32xf32>
    %288 = vector.extract_strided_slice %285 {offsets = [0, 32], sizes = [2, 32], strides = [1, 1]} : vector<2x128xf32> to vector<2x32xf32>
    %289 = vector.extract_strided_slice %286 {offsets = [0, 64], sizes = [2, 32], strides = [1, 1]} : vector<2x128xf32> to vector<2x32xf32>
    %290 = vector.extract_strided_slice %285 {offsets = [0, 96], sizes = [2, 32], strides = [1, 1]} : vector<2x128xf32> to vector<2x32xf32>
    %291 = arith.mulf %288, %254 : vector<2x32xf32>
    %292 = arith.mulf %287, %289 : vector<2x32xf32>
    %293 = arith.addf %291, %292 : vector<2x32xf32>
    %294 = math.tanh %293 : vector<2x32xf32>
    %295 = arith.mulf %290, %294 : vector<2x32xf32>
    %296 = arith.truncf %274 : vector<2x32xf32> to vector<2x32xbf16>
    %cst_47 = arith.constant dense<0.000000e+00> : vector<2x128xf32>
    %297 = tpu.matmul %296, %1, %cst_47 {dimension_numbers = #tpu.dot_dimension_numbers<[1], [0], [0], [1], [0, 0, 1, 1], [], []>} : vector<2x32xbf16>, vector<32x128xbf16>, vector<2x128xf32> -> vector<2x128xf32>
    %298 = arith.addf %18, %297 : vector<2x128xf32>
    %299 = arith.negf %298 : vector<2x128xf32>
    %300 = math.exp %299 : vector<2x128xf32>
    %cst_48 = arith.constant 1.000000e+00 : f32
    %301 = vector.broadcast %cst_48 : f32 to vector<2x128xf32>
    %302 = arith.addf %301, %300 : vector<2x128xf32>
    %303 = arith.divf %301, %302 : vector<2x128xf32>
    %304 = math.tanh %298 : vector<2x128xf32>
    %305 = vector.extract_strided_slice %303 {offsets = [0, 0], sizes = [2, 32], strides = [1, 1]} : vector<2x128xf32> to vector<2x32xf32>
    %306 = vector.extract_strided_slice %303 {offsets = [0, 32], sizes = [2, 32], strides = [1, 1]} : vector<2x128xf32> to vector<2x32xf32>
    %307 = vector.extract_strided_slice %304 {offsets = [0, 64], sizes = [2, 32], strides = [1, 1]} : vector<2x128xf32> to vector<2x32xf32>
    %308 = vector.extract_strided_slice %303 {offsets = [0, 96], sizes = [2, 32], strides = [1, 1]} : vector<2x128xf32> to vector<2x32xf32>
    %309 = arith.mulf %306, %272 : vector<2x32xf32>
    %310 = arith.mulf %305, %307 : vector<2x32xf32>
    %311 = arith.addf %309, %310 : vector<2x32xf32>
    %312 = math.tanh %311 : vector<2x32xf32>
    %313 = arith.mulf %308, %312 : vector<2x32xf32>
    %314 = arith.truncf %313 : vector<2x32xf32> to vector<2x32xbf16>
    %315 = arith.truncf %295 : vector<2x32xf32> to vector<2x32xbf16>
    %316 = tpu.concatenate %314, %315 in 1 : vector<2x32xbf16>, vector<2x32xbf16> -> vector<2x64xbf16>
    %cst_49 = arith.constant dense<0.000000e+00> : vector<2x128xf32>
    %317 = tpu.matmul %316, %3, %cst_49 {dimension_numbers = #tpu.dot_dimension_numbers<[1], [0], [0], [1], [0, 0, 1, 1], [], []>} : vector<2x64xbf16>, vector<64x128xbf16>, vector<2x128xf32> -> vector<2x128xf32>
    %318 = vector.broadcast %4 : vector<1x128xf32> to vector<2x128xf32>
    %319 = arith.addf %317, %318 : vector<2x128xf32>
    %320 = arith.negf %319 : vector<2x128xf32>
    %321 = math.exp %320 : vector<2x128xf32>
    %cst_50 = arith.constant 1.000000e+00 : f32
    %322 = vector.broadcast %cst_50 : f32 to vector<2x128xf32>
    %323 = arith.addf %322, %321 : vector<2x128xf32>
    %324 = arith.divf %322, %323 : vector<2x128xf32>
    %325 = math.tanh %319 : vector<2x128xf32>
    %326 = vector.extract_strided_slice %324 {offsets = [0, 0], sizes = [2, 32], strides = [1, 1]} : vector<2x128xf32> to vector<2x32xf32>
    %327 = vector.extract_strided_slice %324 {offsets = [0, 32], sizes = [2, 32], strides = [1, 1]} : vector<2x128xf32> to vector<2x32xf32>
    %328 = vector.extract_strided_slice %325 {offsets = [0, 64], sizes = [2, 32], strides = [1, 1]} : vector<2x128xf32> to vector<2x32xf32>
    %329 = vector.extract_strided_slice %324 {offsets = [0, 96], sizes = [2, 32], strides = [1, 1]} : vector<2x128xf32> to vector<2x32xf32>
    %330 = arith.mulf %327, %293 : vector<2x32xf32>
    %331 = arith.mulf %326, %328 : vector<2x32xf32>
    %332 = arith.addf %330, %331 : vector<2x32xf32>
    %333 = math.tanh %332 : vector<2x32xf32>
    %334 = arith.mulf %329, %333 : vector<2x32xf32>
    %cst_51 = arith.constant 0.000000e+00 : f32
    %335 = vector.broadcast %cst_51 : f32 to vector<2x32xf32>
    %336 = arith.cmpf oge, %334, %335 : vector<2x32xf32>
    %cst_52 = arith.constant 0.00999999977 : f32
    %337 = vector.broadcast %cst_52 : f32 to vector<2x32xf32>
    %338 = arith.mulf %337, %334 : vector<2x32xf32>
    %339 = arith.select %336, %334, %338 : vector<2x32xi1>, vector<2x32xf32>
    %cst_53 = arith.constant dense<0.000000e+00> : vector<2x1xf32>
    %340 = tpu.matmul %339, %5, %cst_53 {dimension_numbers = #tpu.dot_dimension_numbers<[1], [0], [0], [1], [0, 0, 1, 1], [], []>} : vector<2x32xf32>, vector<32x1xf32>, vector<2x1xf32> -> vector<2x1xf32>
    %341 = vector.broadcast %6 : vector<1x1xf32> to vector<2x1xf32>
    %342 = arith.addf %340, %341 : vector<2x1xf32>
    %343 = arith.negf %342 : vector<2x1xf32>
    %344 = math.exp %343 : vector<2x1xf32>
    %cst_54 = arith.constant 1.000000e+00 : f32
    %345 = vector.broadcast %cst_54 : f32 to vector<2x1xf32>
    %346 = arith.addf %345, %344 : vector<2x1xf32>
    %347 = arith.divf %345, %346 : vector<2x1xf32>
    %c0_55 = arith.constant 0 : index
    %c0_56 = arith.constant 0 : index
    %348 = vector.load %arg8[%c0_55, %c0_56] : memref<2x1xf32, #tpu.memory_space<vmem>>, vector<2x1xf32>
    tpu.vector_store %arg8[%c0_55, %c0_56], %347 {strides = array<i32>} : memref<2x1xf32, #tpu.memory_space<vmem>>, vector<2x1xf32>,
    return
  }
}

</mosaic_0001>

<bundles_post_ra>
// kernel: lstm_linear_forward.1
= control target key start
LH: loop header
LB: loop body
LE: loop exit
PB: predicated region body
PF: predicated region fallthrough
CT: control target
= control target key end

     0   :  { %vm67_vm0 = vcmask 1043456   ;;  %v1961_v0 = vmov 0.0   ;;  %vm60_vm1 = vcmask 31744   ;;  %vm1962_vm2 = vmmov 0   ;;  %s2374_s2 = inlined_call_operand.vmem [shape: bf16[32,128], index: 2, kind: input, shape index: {}]   ;;  %s2375_s1 = inlined_call_operand.vmem [shape: f32[4,128], index: 1, kind: input, shape index: {}]   ;;  %s2376_s0 = inlined_call_operand.vmem [shape: f32[16,4], index: 0, kind: input, shape index: {}]   ;;  %s2377_s3 = inlined_call_operand.vmem [shape: f32[1,128], index: 3, kind: input, shape index: {}]   ;;  %s2378_s4 = inlined_call_operand.vmem [shape: bf16[64,128], index: 4, kind: input, shape index: {}]   ;;  %s2379_s5 = inlined_call_operand.vmem [shape: f32[1,128], index: 5, kind: input, shape index: {}]   ;;  %s2380_s6 = inlined_call_operand.vmem [shape: f32[32,1], index: 6, kind: input, shape index: {}]   ;;  %s2381_s7 = inlined_call_operand.<no memory space> [shape: f32[1,1], index: 7, kind: input, shape index: {}]   ;;  %s2382_s8 = inlined_call_operand.vmem [shape: f32[2,1], index: 8, kind: output, shape index: {}]  }
   0x1   :  { %1639 = vmatprep.subr.bf16.mxu0 %v1961_v0  ;;  %v2016_v1 = vld [vmem:[%s2374_s2] sm:$0xff]   ;;  %1643 = vmatprep.mubr.msk.bf16.mxu0 %vm1962_vm2, %v1961_v0  ;;  %v53_v4 = vld [vmem:[%s2376_s0 + $0x8] sm:$0xff]  ;;  %v1963_v6 = vmov 0   ;;  %v2076_v29 = vld [vmem:[%s2378_s4 + $0x10] sm:$0xff]   ;;  %vm158_vm3 = vcmask 261120   ;;  %vm263_vm4 = vcmask 523264  }
   0x2   :  { %v32_v2 = vld [vmem:[%s2375_s1] sm:$0xf]  ;;  %1640 = vmatpush3.bf16.msra.mxu0 %v2016_v1  ;;  %v2033_v5 = vld [vmem:[%s2374_s2 + $0x8] sm:$0xff]   ;;  %s1964_s2 = smov 64   ;;  %v2084_v31 = vld [vmem:[%s2378_s4 + $0x18] sm:$0xff]   ;;  %vm1511_vm6 = vcmask 1024  }
   0x3   :  { %v52_v3 = vld [vmem:[%s2376_s0] sm:$0xff]  ;;  %1634 = vmatprep.subr.msk.mxu1 %vm67_vm0, %v32_v2  ;;  %1641 = vmatprep.subr.bf16.mxu0 %v1961_v0  ;;  %v2069_v28 = vld [vmem:[%s2378_s4 + $0x8] sm:$0xff]  }
   0x4   :  { %1635 = vmatpush3.msk.msra.mxu1 %vm67_vm0, %v32_v2  ;;  %1636 = vmatprep.mubr.msk.f32.mxu1 %vm60_vm1, %v52_v3  ;;  %v1517_v7 = vld [vmem:[%s2377_s3] ss:$0 sm:$0xff]  ;;  %s1965_s3 = smov 32  }
   0x5   :  { %1637 = vmatmul.mubr.msk.f32.vlgmr.msra.gmra.mrb[0].mxu1 %vm60_vm1, %v53_v4  ;;  %1659 = vmatprep.subr.bf16.mxu1 %v1961_v0  ;;  %v2063_v27 = vld [vmem:[%s2378_s4] sm:$0xff]  }
   0x6   :  { %1663 = vmatprep.mubr.msk.bf16.mxu1 %vm1962_vm2, %v1961_v0  ;;  %1642 = vmatpush3.bf16.msra.mxu0 %v2033_v5  ;;  %v2112_v37 = vld [vmem:[%s2379_s5] ss:$0 sm:$0xff] }
   0x7   :  { %1660 = vmatpush3.bf16.msra.mxu1 %v2016_v1  ;;  %1647 = vmatprep.subr.bf16.mxu0 %v1961_v0 }
   0x8   :  { %1661 = vmatprep.subr.bf16.mxu1 %v1961_v0 }
   0x9   :  { %1644 = vmatmul.mubr.bf16.vlgmr.msra.gmra.mrb[0].mxu0 %v1963_v6 }
   0xa   :  { %1655 = vmatprep.mubr.msk.bf16.mxu0 %vm1962_vm2, %v1961_v0  ;;  %1648 = vmatpush3.bf16.msra.mxu0 %v2063_v27 }
   0xb   :  { %1662 = vmatpush3.bf16.msra.mxu1 %v2033_v5  ;;  %1649 = vmatprep.subr.bf16.mxu0 %v1961_v0 }
   0xc   :  { %1667 = vmatprep.subr.bf16.mxu1 %v1961_v0 }
   0xe   :  { %1650 = vmatpush3.bf16.msra.mxu0 %v2069_v28 }
   0xf   :  { %1651 = vmatprep.subr.bf16.mxu0 %v1961_v0 }
  0x12   :  { %1652 = vmatpush3.bf16.msra.mxu0 %v2076_v29 }
  0x13   :  { %1653 = vmatprep.subr.bf16.mxu0 %v1961_v0 }
  0x16   :  { %1654 = vmatpush3.bf16.msra.mxu0 %v2084_v31 }
  0x17   :  { %1679 = vmatprep.subr.bf16.mxu0 %v1961_v0 }
  0xd8   :  { %v1638_v8 = vpop.f32.mrb[0].mxu1 }
  0xd9   :  { %v2050_v9 = vadd.f32 %v1638_v8, %v1517_v7  ;;  %v137_v10 = vpop.f32.mrb[1].mxu1 }
  0xda   :  { %v2052_v11 = vadd.f32 %v1517_v7, %v137_v10 }
  0xdc   :  { %v196_v12 = vpop.f32.mrb[0].mxu0 }
  0xdd   :  { %v202_v13 = vadd.f32 %v196_v12, %v2052_v11  ;;  %v1645_v14 = vpop.f32.mrb[1].mxu0 }
  0xde   :  { %v199_v15 = vpop.f32.mrb[2].mxu0 }
  0xdf   :  { %1828 = vtanh.f32 %v202_v13  ;;  %v1646_v16 = vpop.f32.mrb[3].mxu0  ;;  %v1523_v18 = vmul.f32 -1.442695, %v202_v13 }
  0xe1   :  { %1830 = vpow2.f32 %v1523_v18 }
  0xe9   :  { %v1829_v17 = vpop.eup %1828 }
  0xea   :  { %212 = vrot.lane.b32.xlu0 %v1829_v17, %s1964_s2 }
  0xeb   :  { %v1831_v19 = vpop.eup %1830 }
  0xec   :  { %v206_v20 = vadd.f32 1.0, %v1831_v19 }
  0xee   :  { %1832 = vrcp.f32 %v206_v20 }
  0xf8   :  { %v1833_v21 = vpop.eup %1832 }
  0xf9   :  { %v210_v24 = vmul.f32 0.0, %v1833_v21 }
 0x15c   :  { %v213_v22 = vpop.permute.xlu0 %212 }
 0x15d   :  { %v215_v23 = vmul.f32 %v1833_v21, %v213_v22 }
 0x15f   :  { %217 = vrot.lane.b32.xlu0 %v215_v23, %s1965_s3 }
 0x1d1   :  { %v218_v25 = vpop.permute.xlu0 %217 }
 0x1d2   :  { %v2057_v26 = vadd.f32 %v218_v25, %v210_v24 }
 0x1d4   :  { %1834 = vtanh.f32 %v2057_v26  ;;  %v384_v63 = vrot.slane %v2057_v26, 6 }
 0x1de   :  { %v1835_v30 = vpop.eup %1834 }
 0x1df   :  { %223 = vrot.lane.b32.xlu1 %v1835_v30, %s1964_s2 }
 0x251   :  { %v224_v32 = vpop.permute.xlu1 %223 }
 0x252   :  { %v226_v33 = vmul.f32 %v1833_v21, %v224_v32 }
 0x254   :  { %v227_v34 = vpack.c.bf16 %v226_v33, %v226_v33 }
 0x256   :  { %229 = vrot.lane.b32.xlu1 %v227_v34, %s1965_s3 }
 0x2c8   :  { %v230_v35 = vpop.permute.xlu1 %229 }
 0x2c9   :  { %v232_v36 = vsel %vm158_vm3, %v230_v35, 0  ;;  %1664 = vmatmul.mubr.msk.bf16.vlgmr.msra.gmra.mrb[4].mxu1 %vm158_vm3, %v230_v35 }
 0x2ca   :  { %1656 = vmatmul.mubr.msk.bf16.vlgmr.msra.gmra.mrb[4].mxu0 %vm263_vm4, %v232_v36  ;;  %1668 = vmatpush3.bf16.msra.mxu1 %v2063_v27 }
 0x2cb   :  { %1669 = vmatprep.subr.bf16.mxu1 %v1961_v0  ;;  %1680 = vmatpush3.bf16.msra.mxu0 %v2016_v1 }
 0x2cc   :  { %1681 = vmatprep.subr.bf16.mxu0 %v1961_v0  ;;  %1675 = vmatprep.mubr.msk.bf16.mxu1 %vm1962_vm2, %v1961_v0 }
 0x2cd   :  { %1683 = vmatprep.mubr.msk.bf16.mxu0 %vm1962_vm2, %v1961_v0 }
 0x2ce   :  { %1670 = vmatpush3.bf16.msra.mxu1 %v2069_v28 }
 0x2cf   :  { %1671 = vmatprep.subr.bf16.mxu1 %v1961_v0  ;;  %1682 = vmatpush3.bf16.msra.mxu0 %v2033_v5 }
 0x2d0   :  { %1687 = vmatprep.subr.bf16.mxu0 %v1961_v0 }
 0x2d2   :  { %1672 = vmatpush3.bf16.msra.mxu1 %v2076_v29 }
 0x2d3   :  { %1673 = vmatprep.subr.bf16.mxu1 %v1961_v0 }
 0x2d6   :  { %1674 = vmatpush3.bf16.msra.mxu1 %v2084_v31 }
 0x2d7   :  { %1699 = vmatprep.subr.bf16.mxu1 %v1961_v0 }
 0x39c   :  { %v366_v38 = vpop.f32.mrb[4].mxu1 }
 0x39d   :  { %v373_v39 = vrot.slane %v366_v38, 6  ;;  %v300_v40 = vpop.f32.mrb[4].mxu0  ;;  %v1665_v41 = vpop.f32.mrb[5].mxu1 }
 0x39e   :  { %v301_v42 = vadd.f32 %v2112_v37, %v300_v40  ;;  %v1657_v43 = vpop.f32.mrb[5].mxu0  ;;  %v369_v44 = vpop.f32.mrb[6].mxu1 }
 0x39f   :  { %v375_v45 = vadd.f32 %v373_v39, %v2052_v11  ;;  %v303_v46 = vpop.f32.mrb[6].mxu0  ;;  %v1666_v47 = vpop.f32.mrb[7].mxu1 }
 0x3a0   :  { %1836 = vtanh.f32 %v301_v42  ;;  %v1658_v48 = vpop.f32.mrb[7].mxu0  ;;  %v1530_v51 = vmul.f32 -1.442695, %v301_v42 }
 0x3a1   :  { %1838 = vtanh.f32 %v375_v45  ;;  %v1532_v52 = vmul.f32 -1.442695, %v375_v45 }
 0x3a2   :  { %1840 = vpow2.f32 %v1530_v51 }
 0x3a3   :  { %1842 = vpow2.f32 %v1532_v52 }
 0x3aa   :  { %v1837_v49 = vpop.eup %1836 }
 0x3ab   :  { %v1839_v50 = vpop.eup %1838  ;;  %315 = vrot.lane.b32.xlu0 %v1837_v49, %s1964_s2 }
 0x3ac   :  { %388 = vrot.lane.b32.xlu1 %v1839_v50, %s1964_s2  ;;  %v1841_v53 = vpop.eup %1840 }
 0x3ad   :  { %v1843_v54 = vpop.eup %1842  ;;  %v309_v55 = vadd.f32 1.0, %v1841_v53 }
 0x3ae   :  { %v379_v56 = vadd.f32 1.0, %v1843_v54 }
 0x3af   :  { %1844 = vrcp.f32 %v309_v55 }
 0x3b0   :  { %1846 = vrcp.f32 %v379_v56 }
 0x3b9   :  { %v1845_v57 = vpop.eup %1844 }
 0x3ba   :  { %v1847_v59 = vpop.eup %1846  ;;  %v313_v2 = vmul.f32 0.0, %v1845_v57 }
 0x3bb   :  { %v386_v4 = vmul.f32 %v1847_v59, %v384_v63 }
 0x41d   :  { %v316_v58 = vpop.permute.xlu0 %315 }
 0x41e   :  { %v318_v60 = vmul.f32 %v1845_v57, %v316_v58  ;;  %v389_v61 = vpop.permute.xlu1 %388 }
 0x41f   :  { %v391_v62 = vmul.f32 %v1847_v59, %v389_v61 }
 0x420   :  { %320 = vrot.lane.b32.xlu0 %v318_v60, %s1965_s3 }
 0x421   :  { %393 = vrot.lane.b32.xlu1 %v391_v62, %s1965_s3 }
 0x492   :  { %v321_v3 = vpop.permute.xlu0 %320 }
 0x493   :  { %v2121_v6 = vadd.f32 %v321_v3, %v313_v2  ;;  %v394_v7 = vpop.permute.xlu1 %393 }
 0x494   :  { %v2123_v8 = vadd.f32 %v394_v7, %v386_v4 }
 0x495   :  { %1848 = vtanh.f32 %v2121_v6 }
 0x496   :  { %1850 = vtanh.f32 %v2123_v8 }
 0x49f   :  { %v1849_v10 = vpop.eup %1848 }
 0x4a0   :  { %v1851_v12 = vpop.eup %1850  ;;  %326 = vrot.lane.b32.xlu0 %v1849_v10, %s1964_s2 }
 0x4a1   :  { %399 = vrot.lane.b32.xlu1 %v1851_v12, %s1964_s2 }
 0x512   :  { %v327_v13 = vpop.permute.xlu0 %326 }
 0x513   :  { %v329_v14 = vmul.f32 %v1845_v57, %v327_v13  ;;  %v400_v15 = vpop.permute.xlu1 %399  ;;  %v542_v57 = vrot.slane %v2123_v8, 6 }
 0x514   :  { %v402_v16 = vmul.f32 %v1847_v59, %v400_v15 }
 0x515   :  { %v404_v17 = vpack.c.bf16 %v329_v14, %v329_v14 }
 0x516   :  { %v403_v18 = vpack.c.bf16 %v402_v16, %v402_v16 }
 0x517   :  { %v409_v19 = vrot.slane %v404_v17, 7 }
 0x518   :  { %406 = vrot.lane.b32.xlu0 %v403_v18, %s1965_s3  ;;  %v484_v20 = vrot.slane %v403_v18, 1 }
 0x519   :  { %410 = vrot.lane.b32.xlu1 %v409_v19, %s1964_s2 }
 0x51c   :  { %485 = vrot.lane.b32.xlu0 %v484_v20, %s1965_s3 }
 0x58a   :  { %v407_v21 = vpop.permute.xlu0 %406 }
 0x58b   :  { %v411_v22 = vpop.permute.xlu1 %410 }
 0x58c   :  { %v414_v23 = vsel %vm158_vm3, %v407_v21, %v411_v22 }
 0x58d   :  { %v416_v24 = vrot.slane %v414_v23, 1 }
 0x58e   :  { %v486_v25 = vpop.permute.xlu0 %485 }
 0x58f   :  { %1676 = vmatmul.mubr.msk.bf16.vlgmr.msra.gmra.mrb[8].mxu1 %vm263_vm4, %v416_v24  ;;  %1684 = vmatmul.mubr.msk.bf16.vlgmr.msra.gmra.mrb[8].mxu0 %vm158_vm3, %v486_v25 }
 0x590   :  { %1688 = vmatpush3.bf16.msra.mxu0 %v2063_v27  ;;  %1700 = vmatpush3.bf16.msra.mxu1 %v2016_v1 }
 0x591   :  { %1689 = vmatprep.subr.bf16.mxu0 %v1961_v0  ;;  %1701 = vmatprep.subr.bf16.mxu1 %v1961_v0 }
 0x592   :  { %1695 = vmatprep.mubr.msk.bf16.mxu0 %vm1962_vm2, %v1961_v0  ;;  %1703 = vmatprep.mubr.msk.bf16.mxu1 %vm1962_vm2, %v1961_v0 }
 0x594   :  { %1690 = vmatpush3.bf16.msra.mxu0 %v2069_v28  ;;  %1702 = vmatpush3.bf16.msra.mxu1 %v2033_v5 }
 0x595   :  { %1691 = vmatprep.subr.bf16.mxu0 %v1961_v0  ;;  %1707 = vmatprep.subr.bf16.mxu1 %v1961_v0 }
 0x598   :  { %1692 = vmatpush3.bf16.msra.mxu0 %v2076_v29 }
 0x599   :  { %1693 = vmatprep.subr.bf16.mxu0 %v1961_v0 }
 0x59c   :  { %1694 = vmatpush3.bf16.msra.mxu0 %v2084_v31 }
 0x59d   :  { %1719 = vmatprep.subr.bf16.mxu0 %v1961_v0 }
 0x662   :  { %v454_v26 = vpop.f32.mrb[8].mxu1  ;;  %v524_v30 = vpop.f32.mrb[8].mxu0 }
 0x663   :  { %v455_v32 = vadd.f32 %v2112_v37, %v454_v26  ;;  %v531_v33 = vrot.slane %v524_v30, 4  ;;  %v1677_v34 = vpop.f32.mrb[9].mxu1  ;;  %v1685_v35 = vpop.f32.mrb[9].mxu0 }
 0x664   :  { %v457_v36 = vpop.f32.mrb[10].mxu1  ;;  %v527_v38 = vpop.f32.mrb[10].mxu0 }
 0x665   :  { %1852 = vtanh.f32 %v455_v32  ;;  %v533_v39 = vadd.f32 %v531_v33, %v2052_v11  ;;  %v1678_v40 = vpop.f32.mrb[11].mxu1  ;;  %v1686_v41 = vpop.f32.mrb[11].mxu0  ;;  %v1534_v44 = vmul.f32 -1.442695, %v455_v32 }
 0x667   :  { %1854 = vtanh.f32 %v533_v39  ;;  %v1536_v45 = vmul.f32 -1.442695, %v533_v39 }
 0x668   :  { %1856 = vpow2.f32 %v1534_v44 }
 0x669   :  { %1858 = vpow2.f32 %v1536_v45 }
 0x66f   :  { %v1853_v42 = vpop.eup %1852 }
 0x670   :  { %469 = vrot.lane.b32.xlu1 %v1853_v42, %s1964_s2 }
 0x671   :  { %v1855_v43 = vpop.eup %1854 }
 0x672   :  { %546 = vrot.lane.b32.xlu0 %v1855_v43, %s1964_s2  ;;  %v1857_v46 = vpop.eup %1856 }
 0x673   :  { %v1859_v47 = vpop.eup %1858  ;;  %v463_v48 = vadd.f32 1.0, %v1857_v46 }
 0x674   :  { %v537_v49 = vadd.f32 1.0, %v1859_v47 }
 0x675   :  { %1860 = vrcp.f32 %v463_v48 }
 0x676   :  { %1862 = vrcp.f32 %v537_v49 }
 0x67f   :  { %v1861_v50 = vpop.eup %1860 }
 0x680   :  { %v1863_v53 = vpop.eup %1862  ;;  %v467_v56 = vmul.f32 %v1861_v50, %v2121_v6 }
 0x681   :  { %v544_v60 = vmul.f32 %v1863_v53, %v542_v57 }
 0x6e2   :  { %v470_v51 = vpop.permute.xlu1 %469 }
 0x6e3   :  { %v472_v52 = vmul.f32 %v1861_v50, %v470_v51 }
 0x6e4   :  { %v547_v54 = vpop.permute.xlu0 %546 }
 0x6e5   :  { %474 = vrot.lane.b32.xlu1 %v472_v52, %s1965_s3  ;;  %v549_v55 = vmul.f32 %v1863_v53, %v547_v54 }
 0x6e7   :  { %551 = vrot.lane.b32.xlu0 %v549_v55, %s1965_s3 }
 0x757   :  { %v475_v58 = vpop.permute.xlu1 %474 }
 0x758   :  { %v2159_v59 = vadd.f32 %v475_v58, %v467_v56 }
 0x759   :  { %v552_v61 = vpop.permute.xlu0 %551 }
 0x75a   :  { %1864 = vtanh.f32 %v2159_v59  ;;  %v2162_v62 = vadd.f32 %v552_v61, %v544_v60 }
 0x75c   :  { %1866 = vtanh.f32 %v2162_v62  ;;  %v700_v49 = vrot.slane %v2162_v62, 6 }
 0x764   :  { %v1865_v63 = vpop.eup %1864 }
 0x765   :  { %480 = vrot.lane.b32.xlu1 %v1865_v63, %s1964_s2 }
 0x766   :  { %v1867_v2 = vpop.eup %1866 }
 0x767   :  { %557 = vrot.lane.b32.xlu0 %v1867_v2, %s1964_s2 }
 0x7d7   :  { %v481_v3 = vpop.permute.xlu1 %480 }
 0x7d8   :  { %v483_v4 = vmul.f32 %v1861_v50, %v481_v3 }
 0x7d9   :  { %v558_v7 = vpop.permute.xlu0 %557 }
 0x7da   :  { %v562_v6 = vpack.c.bf16 %v483_v4, %v483_v4  ;;  %v560_v8 = vmul.f32 %v1863_v53, %v558_v7 }
 0x7dc   :  { %v567_v10 = vrot.slane %v562_v6, 6  ;;  %v561_v12 = vpack.c.bf16 %v560_v8, %v560_v8 }
 0x7de   :  { %568 = vrot.lane.b32.xlu0 %v567_v10, %s1964_s2  ;;  %564 = vrot.lane.b32.xlu1 %v561_v12, %s1965_s3  ;;  %v642_v13 = vrot.slane %v561_v12, 2 }
 0x7e2   :  { %643 = vrot.lane.b32.xlu1 %v642_v13, %s1965_s3 }
 0x850   :  { %v569_v14 = vpop.permute.xlu0 %568  ;;  %v565_v15 = vpop.permute.xlu1 %564 }
 0x851   :  { %v572_v16 = vsel %vm158_vm3, %v565_v15, %v569_v14 }
 0x852   :  { %v574_v17 = vrot.slane %v572_v16, 2 }
 0x854   :  { %v644_v18 = vpop.permute.xlu1 %643  ;;  %1696 = vmatmul.mubr.msk.bf16.vlgmr.msra.gmra.mrb[12].mxu0 %vm263_vm4, %v574_v17 }
 0x855   :  { %1704 = vmatmul.mubr.msk.bf16.vlgmr.msra.gmra.mrb[12].mxu1 %vm158_vm3, %v644_v18  ;;  %1720 = vmatpush3.bf16.msra.mxu0 %v2016_v1 }
 0x856   :  { %1708 = vmatpush3.bf16.msra.mxu1 %v2063_v27  ;;  %1721 = vmatprep.subr.bf16.mxu0 %v1961_v0 }
 0x857   :  { %1709 = vmatprep.subr.bf16.mxu1 %v1961_v0  ;;  %1715 = vmatprep.mubr.msk.bf16.mxu1 %vm1962_vm2, %v1961_v0 }
 0x858   :  { %1723 = vmatprep.mubr.msk.bf16.mxu0 %vm1962_vm2, %v1961_v0 }
 0x859   :  { %1722 = vmatpush3.bf16.msra.mxu0 %v2033_v5 }
 0x85a   :  { %1710 = vmatpush3.bf16.msra.mxu1 %v2069_v28  ;;  %1727 = vmatprep.subr.bf16.mxu0 %v1961_v0 }
 0x85b   :  { %1711 = vmatprep.subr.bf16.mxu1 %v1961_v0 }
 0x85e   :  { %1712 = vmatpush3.bf16.msra.mxu1 %v2076_v29 }
 0x85f   :  { %1713 = vmatprep.subr.bf16.mxu1 %v1961_v0 }
 0x862   :  { %1714 = vmatpush3.bf16.msra.mxu1 %v2084_v31 }
 0x863   :  { %1739 = vmatprep.subr.bf16.mxu1 %v1961_v0 }
 0x927   :  { %v612_v19 = vpop.f32.mrb[12].mxu0 }
 0x928   :  { %v613_v20 = vadd.f32 %v2112_v37, %v612_v19  ;;  %v1697_v21 = vpop.f32.mrb[13].mxu0  ;;  %v682_v22 = vpop.f32.mrb[12].mxu1 }
 0x929   :  { %v689_v23 = vrot.slane %v682_v22, 2  ;;  %v615_v24 = vpop.f32.mrb[14].mxu0  ;;  %v1705_v25 = vpop.f32.mrb[13].mxu1 }
 0x92a   :  { %1868 = vtanh.f32 %v613_v20  ;;  %v1698_v26 = vpop.f32.mrb[15].mxu0  ;;  %v685_v30 = vpop.f32.mrb[14].mxu1  ;;  %v1538_v36 = vmul.f32 -1.442695, %v613_v20 }
 0x92b   :  { %v691_v32 = vadd.f32 %v689_v23, %v2052_v11  ;;  %v1706_v33 = vpop.f32.mrb[15].mxu1 }
 0x92d   :  { %1870 = vtanh.f32 %v691_v32  ;;  %v1540_v38 = vmul.f32 -1.442695, %v691_v32 }
 0x92e   :  { %1872 = vpow2.f32 %v1538_v36 }
 0x92f   :  { %1874 = vpow2.f32 %v1540_v38 }
 0x934   :  { %v1869_v34 = vpop.eup %1868 }
 0x935   :  { %627 = vrot.lane.b32.xlu0 %v1869_v34, %s1964_s2 }
 0x937   :  { %v1871_v35 = vpop.eup %1870 }
 0x938   :  { %704 = vrot.lane.b32.xlu1 %v1871_v35, %s1964_s2  ;;  %v1873_v39 = vpop.eup %1872 }
 0x939   :  { %v1875_v40 = vpop.eup %1874  ;;  %v621_v41 = vadd.f32 1.0, %v1873_v39 }
 0x93a   :  { %v695_v42 = vadd.f32 1.0, %v1875_v40 }
 0x93b   :  { %1876 = vrcp.f32 %v621_v41 }
 0x93c   :  { %1878 = vrcp.f32 %v695_v42 }
 0x945   :  { %v1877_v43 = vpop.eup %1876 }
 0x946   :  { %v1879_v45 = vpop.eup %1878  ;;  %v625_v48 = vmul.f32 %v1877_v43, %v2159_v59 }
 0x947   :  { %v702_v52 = vmul.f32 %v1879_v45, %v700_v49 }
 0x9a7   :  { %v628_v11 = vpop.permute.xlu0 %627 }
 0x9a8   :  { %v630_v44 = vmul.f32 %v1877_v43, %v628_v11 }
 0x9aa   :  { %v705_v46 = vpop.permute.xlu1 %704  ;;  %632 = vrot.lane.b32.xlu0 %v630_v44, %s1965_s3 }
 0x9ab   :  { %v707_v47 = vmul.f32 %v1879_v45, %v705_v46 }
 0x9ad   :  { %709 = vrot.lane.b32.xlu1 %v707_v47, %s1965_s3 }
 0xa1c   :  { %v633_v50 = vpop.permute.xlu0 %632 }
 0xa1d   :  { %v2197_v51 = vadd.f32 %v633_v50, %v625_v48 }
 0xa1f   :  { %1880 = vtanh.f32 %v2197_v51  ;;  %v710_v53 = vpop.permute.xlu1 %709 }
 0xa20   :  { %v2200_v54 = vadd.f32 %v710_v53, %v702_v52 }
 0xa22   :  { %1882 = vtanh.f32 %v2200_v54  ;;  %v855_v40 = vrot.slane %v2200_v54, 6 }
 0xa29   :  { %v1881_v55 = vpop.eup %1880 }
 0xa2a   :  { %638 = vrot.lane.b32.xlu0 %v1881_v55, %s1964_s2 }
 0xa2c   :  { %v1883_v56 = vpop.eup %1882 }
 0xa2d   :  { %715 = vrot.lane.b32.xlu1 %v1883_v56, %s1964_s2 }
 0xa9c   :  { %v639_v57 = vpop.permute.xlu0 %638 }
 0xa9d   :  { %v641_v58 = vmul.f32 %v1877_v43, %v639_v57 }
 0xa9f   :  { %v720_v59 = vpack.c.bf16 %v641_v58, %v641_v58  ;;  %v716_v60 = vpop.permute.xlu1 %715 }
 0xaa0   :  { %v718_v61 = vmul.f32 %v1879_v45, %v716_v60 }
 0xaa1   :  { %v725_v62 = vrot.slane %v720_v59, 5 }
 0xaa2   :  { %v719_v63 = vpack.c.bf16 %v718_v61, %v718_v61 }
 0xaa3   :  { %726 = vrot.lane.b32.xlu1 %v725_v62, %s1964_s2 }
 0xaa4   :  { %722 = vrot.lane.b32.xlu0 %v719_v63, %s1965_s3  ;;  %v800_v2 = vrot.slane %v719_v63, 3 }
 0xaa8   :  { %801 = vrot.lane.b32.xlu0 %v800_v2, %s1965_s3 }
 0xb15   :  { %v727_v3 = vpop.permute.xlu1 %726 }
 0xb16   :  { %v723_v4 = vpop.permute.xlu0 %722 }
 0xb17   :  { %v730_v6 = vsel %vm158_vm3, %v723_v4, %v727_v3 }
 0xb18   :  { %v732_v7 = vrot.slane %v730_v6, 3 }
 0xb1a   :  { %1716 = vmatmul.mubr.msk.bf16.vlgmr.msra.gmra.mrb[16].mxu1 %vm263_vm4, %v732_v7  ;;  %v802_v8 = vpop.permute.xlu0 %801 }
 0xb1b   :  { %1724 = vmatmul.mubr.msk.bf16.vlgmr.msra.gmra.mrb[16].mxu0 %vm158_vm3, %v802_v8  ;;  %1740 = vmatpush3.bf16.msra.mxu1 %v2016_v1 }
 0xb1c   :  { %1728 = vmatpush3.bf16.msra.mxu0 %v2063_v27  ;;  %1741 = vmatprep.subr.bf16.mxu1 %v1961_v0 }
 0xb1d   :  { %1729 = vmatprep.subr.bf16.mxu0 %v1961_v0  ;;  %1743 = vmatprep.mubr.msk.bf16.mxu1 %vm1962_vm2, %v1961_v0 }
 0xb1e   :  { %1735 = vmatprep.mubr.msk.bf16.mxu0 %vm1962_vm2, %v1961_v0 }
 0xb1f   :  { %1742 = vmatpush3.bf16.msra.mxu1 %v2033_v5 }
 0xb20   :  { %1730 = vmatpush3.bf16.msra.mxu0 %v2069_v28  ;;  %1747 = vmatprep.subr.bf16.mxu1 %v1961_v0 }
 0xb21   :  { %1731 = vmatprep.subr.bf16.mxu0 %v1961_v0 }
 0xb24   :  { %1732 = vmatpush3.bf16.msra.mxu0 %v2076_v29 }
 0xb25   :  { %1733 = vmatprep.subr.bf16.mxu0 %v1961_v0 }
 0xb28   :  { %1734 = vmatpush3.bf16.msra.mxu0 %v2084_v31 }
 0xb29   :  { %1759 = vmatprep.subr.bf16.mxu0 %v1961_v0 }
 0xbed   :  { %v770_v10 = vpop.f32.mrb[16].mxu1 }
 0xbee   :  { %v771_v12 = vadd.f32 %v2112_v37, %v770_v10  ;;  %v1717_v13 = vpop.f32.mrb[17].mxu1  ;;  %v840_v14 = vpop.f32.mrb[16].mxu0 }
 0xbef   :  { %v846_v15 = vadd.f32 %v840_v14, %v2050_v9  ;;  %v773_v16 = vpop.f32.mrb[18].mxu1  ;;  %v1725_v17 = vpop.f32.mrb[17].mxu0 }
 0xbf0   :  { %1884 = vtanh.f32 %v771_v12  ;;  %v1718_v18 = vpop.f32.mrb[19].mxu1  ;;  %v843_v19 = vpop.f32.mrb[18].mxu0  ;;  %v1542_v23 = vmul.f32 -1.442695, %v771_v12 }
 0xbf1   :  { %1886 = vtanh.f32 %v846_v15  ;;  %v1726_v20 = vpop.f32.mrb[19].mxu0  ;;  %v1544_v24 = vmul.f32 -1.442695, %v846_v15 }
 0xbf2   :  { %1888 = vpow2.f32 %v1542_v23 }
 0xbf3   :  { %1890 = vpow2.f32 %v1544_v24 }
 0xbfa   :  { %v1885_v21 = vpop.eup %1884 }
 0xbfb   :  { %v1887_v22 = vpop.eup %1886  ;;  %785 = vrot.lane.b32.xlu1 %v1885_v21, %s1964_s2 }
 0xbfc   :  { %859 = vrot.lane.b32.xlu0 %v1887_v22, %s1964_s2  ;;  %v1889_v25 = vpop.eup %1888 }
 0xbfd   :  { %v1891_v26 = vpop.eup %1890  ;;  %v779_v30 = vadd.f32 1.0, %v1889_v25 }
 0xbfe   :  { %v850_v32 = vadd.f32 1.0, %v1891_v26 }
 0xbff   :  { %1892 = vrcp.f32 %v779_v30 }
 0xc00   :  { %1894 = vrcp.f32 %v850_v32 }
 0xc09   :  { %v1893_v33 = vpop.eup %1892 }
 0xc0a   :  { %v1895_v35 = vpop.eup %1894  ;;  %v783_v41 = vmul.f32 %v1893_v33, %v2197_v51 }
 0xc0b   :  { %v857_v43 = vmul.f32 %v1895_v35, %v855_v40 }
 0xc6d   :  { %v786_v34 = vpop.permute.xlu1 %785 }
 0xc6e   :  { %v788_v36 = vmul.f32 %v1893_v33, %v786_v34  ;;  %v860_v38 = vpop.permute.xlu0 %859 }
 0xc6f   :  { %v862_v39 = vmul.f32 %v1895_v35, %v860_v38 }
 0xc70   :  { %790 = vrot.lane.b32.xlu1 %v788_v36, %s1965_s3 }
 0xc71   :  { %864 = vrot.lane.b32.xlu0 %v862_v39, %s1965_s3 }
 0xce2   :  { %v791_v42 = vpop.permute.xlu1 %790 }
 0xce3   :  { %v2235_v11 = vadd.f32 %v791_v42, %v783_v41  ;;  %v865_v44 = vpop.permute.xlu0 %864 }
 0xce4   :  { %v2237_v45 = vadd.f32 %v865_v44, %v857_v43 }
 0xce5   :  { %1896 = vtanh.f32 %v2235_v11 }
 0xce6   :  { %1898 = vtanh.f32 %v2237_v45  ;;  %v1005_v23 = vrot.slane %v2237_v45, 6 }
 0xcef   :  { %v1897_v46 = vpop.eup %1896 }
 0xcf0   :  { %v1899_v47 = vpop.eup %1898  ;;  %796 = vrot.lane.b32.xlu1 %v1897_v46, %s1964_s2 }
 0xcf1   :  { %870 = vrot.lane.b32.xlu0 %v1899_v47, %s1964_s2 }
 0xd62   :  { %v797_v48 = vpop.permute.xlu1 %796 }
 0xd63   :  { %v799_v49 = vmul.f32 %v1893_v33, %v797_v48  ;;  %v871_v50 = vpop.permute.xlu0 %870 }
 0xd64   :  { %v873_v51 = vmul.f32 %v1895_v35, %v871_v50 }
 0xd65   :  { %v875_v52 = vpack.c.bf16 %v799_v49, %v799_v49 }
 0xd66   :  { %v874_v53 = vpack.c.bf16 %v873_v51, %v873_v51 }
 0xd67   :  { %880 = vrot.lane.b32.xlu0 %v875_v52, %s1964_s2 }
 0xd68   :  { %877 = vrot.lane.b32.xlu1 %v874_v53, %s1965_s3 }
 0xdd9   :  { %v881_v54 = vpop.permute.xlu0 %880 }
 0xdda   :  { %v878_v55 = vpop.permute.xlu1 %877 }
 0xddb   :  { %v884_v56 = vsel %vm158_vm3, %v878_v55, %v881_v54  ;;  %1744 = vmatmul.mubr.msk.bf16.vlgmr.msra.gmra.mrb[20].mxu1 %vm158_vm3, %v878_v55 }
 0xddc   :  { %1736 = vmatmul.mubr.msk.bf16.vlgmr.msra.gmra.mrb[20].mxu0 %vm263_vm4, %v884_v56  ;;  %1748 = vmatpush3.bf16.msra.mxu1 %v2063_v27 }
 0xddd   :  { %1749 = vmatprep.subr.bf16.mxu1 %v1961_v0  ;;  %1760 = vmatpush3.bf16.msra.mxu0 %v2016_v1 }
 0xdde   :  { %1761 = vmatprep.subr.bf16.mxu0 %v1961_v0  ;;  %1755 = vmatprep.mubr.msk.bf16.mxu1 %vm1962_vm2, %v1961_v0 }
 0xddf   :  { %1763 = vmatprep.mubr.msk.bf16.mxu0 %vm1962_vm2, %v1961_v0 }
 0xde0   :  { %1750 = vmatpush3.bf16.msra.mxu1 %v2069_v28 }
 0xde1   :  { %1751 = vmatprep.subr.bf16.mxu1 %v1961_v0  ;;  %1762 = vmatpush3.bf16.msra.mxu0 %v2033_v5 }
 0xde2   :  { %1767 = vmatprep.subr.bf16.mxu0 %v1961_v0 }
 0xde4   :  { %1752 = vmatpush3.bf16.msra.mxu1 %v2076_v29 }
 0xde5   :  { %1753 = vmatprep.subr.bf16.mxu1 %v1961_v0 }
 0xde8   :  { %1754 = vmatpush3.bf16.msra.mxu1 %v2084_v31 }
 0xde9   :  { %1779 = vmatprep.subr.bf16.mxu1 %v1961_v0 }
 0xeae   :  { %v987_v57 = vpop.f32.mrb[20].mxu1 }
 0xeaf   :  { %v994_v58 = vrot.slane %v987_v57, 6  ;;  %v921_v59 = vpop.f32.mrb[20].mxu0  ;;  %v1745_v60 = vpop.f32.mrb[21].mxu1 }
 0xeb0   :  { %v922_v61 = vadd.f32 %v2112_v37, %v921_v59  ;;  %v1737_v62 = vpop.f32.mrb[21].mxu0  ;;  %v990_v63 = vpop.f32.mrb[22].mxu1 }
 0xeb1   :  { %v996_v2 = vadd.f32 %v994_v58, %v2050_v9  ;;  %v924_v3 = vpop.f32.mrb[22].mxu0  ;;  %v1746_v4 = vpop.f32.mrb[23].mxu1 }
 0xeb2   :  { %1900 = vtanh.f32 %v922_v61  ;;  %v1738_v6 = vpop.f32.mrb[23].mxu0  ;;  %v1546_v10 = vmul.f32 -1.442695, %v922_v61 }
 0xeb3   :  { %1902 = vtanh.f32 %v996_v2  ;;  %v1548_v12 = vmul.f32 -1.442695, %v996_v2 }
 0xeb4   :  { %1904 = vpow2.f32 %v1546_v10 }
 0xeb5   :  { %1906 = vpow2.f32 %v1548_v12 }
 0xebc   :  { %v1901_v7 = vpop.eup %1900 }
 0xebd   :  { %v1903_v8 = vpop.eup %1902  ;;  %936 = vrot.lane.b32.xlu1 %v1901_v7, %s1964_s2 }
 0xebe   :  { %1009 = vrot.lane.b32.xlu0 %v1903_v8, %s1964_s2  ;;  %v1905_v13 = vpop.eup %1904 }
 0xebf   :  { %v1907_v14 = vpop.eup %1906  ;;  %v930_v15 = vadd.f32 1.0, %v1905_v13 }
 0xec0   :  { %v1000_v16 = vadd.f32 1.0, %v1907_v14 }
 0xec1   :  { %1908 = vrcp.f32 %v930_v15 }
 0xec2   :  { %1910 = vrcp.f32 %v1000_v16 }
 0xecb   :  { %v1909_v17 = vpop.eup %1908 }
 0xecc   :  { %v1911_v19 = vpop.eup %1910  ;;  %v934_v24 = vmul.f32 %v1909_v17, %v2235_v11 }
 0xecd   :  { %v1007_v26 = vmul.f32 %v1911_v19, %v1005_v23 }
 0xf2f   :  { %v937_v18 = vpop.permute.xlu1 %936 }
 0xf30   :  { %v939_v20 = vmul.f32 %v1909_v17, %v937_v18  ;;  %v1010_v21 = vpop.permute.xlu0 %1009 }
 0xf31   :  { %v1012_v22 = vmul.f32 %v1911_v19, %v1010_v21 }
 0xf32   :  { %941 = vrot.lane.b32.xlu1 %v939_v20, %s1965_s3 }
 0xf33   :  { %1014 = vrot.lane.b32.xlu0 %v1012_v22, %s1965_s3 }
 0xfa4   :  { %v942_v25 = vpop.permute.xlu1 %941 }
 0xfa5   :  { %v2272_v30 = vadd.f32 %v942_v25, %v934_v24  ;;  %v1015_v32 = vpop.permute.xlu0 %1014 }
 0xfa6   :  { %v2274_v33 = vadd.f32 %v1015_v32, %v1007_v26 }
 0xfa7   :  { %1912 = vtanh.f32 %v2272_v30 }
 0xfa8   :  { %1914 = vtanh.f32 %v2274_v33  ;;  %v1163_v14 = vrot.slane %v2274_v33, 6 }
 0xfb1   :  { %v1913_v34 = vpop.eup %1912 }
 0xfb2   :  { %v1915_v35 = vpop.eup %1914  ;;  %947 = vrot.lane.b32.xlu1 %v1913_v34, %s1964_s2 }
 0xfb3   :  { %1020 = vrot.lane.b32.xlu0 %v1915_v35, %s1964_s2 }
0x1024   :  { %v948_v36 = vpop.permute.xlu1 %947 }
0x1025   :  { %v950_v38 = vmul.f32 %v1909_v17, %v948_v36  ;;  %v1021_v39 = vpop.permute.xlu0 %1020 }
0x1026   :  { %v1023_v40 = vmul.f32 %v1911_v19, %v1021_v39 }
0x1027   :  { %v1025_v41 = vpack.c.bf16 %v950_v38, %v950_v38 }
0x1028   :  { %v1024_v42 = vpack.c.bf16 %v1023_v40, %v1023_v40 }
0x1029   :  { %v1030_v43 = vrot.slane %v1025_v41, 7 }
0x102a   :  { %1027 = vrot.lane.b32.xlu1 %v1024_v42, %s1965_s3  ;;  %v1105_v11 = vrot.slane %v1024_v42, 1 }
0x102b   :  { %1031 = vrot.lane.b32.xlu0 %v1030_v43, %s1964_s2 }
0x102e   :  { %1106 = vrot.lane.b32.xlu1 %v1105_v11, %s1965_s3 }
0x109c   :  { %v1028_v44 = vpop.permute.xlu1 %1027 }
0x109d   :  { %v1032_v45 = vpop.permute.xlu0 %1031 }
0x109e   :  { %v1035_v46 = vsel %vm158_vm3, %v1028_v44, %v1032_v45 }
0x109f   :  { %v1037_v47 = vrot.slane %v1035_v46, 1 }
0x10a0   :  { %v1107_v48 = vpop.permute.xlu1 %1106 }
0x10a1   :  { %1756 = vmatmul.mubr.msk.bf16.vlgmr.msra.gmra.mrb[24].mxu1 %vm263_vm4, %v1037_v47  ;;  %1764 = vmatmul.mubr.msk.bf16.vlgmr.msra.gmra.mrb[24].mxu0 %vm158_vm3, %v1107_v48 }
0x10a2   :  { %1768 = vmatpush3.bf16.msra.mxu0 %v2063_v27  ;;  %1780 = vmatpush3.bf16.msra.mxu1 %v2016_v1 }
0x10a3   :  { %1769 = vmatprep.subr.bf16.mxu0 %v1961_v0  ;;  %1781 = vmatprep.subr.bf16.mxu1 %v1961_v0 }
0x10a4   :  { %1775 = vmatprep.mubr.msk.bf16.mxu0 %vm1962_vm2, %v1961_v0  ;;  %1783 = vmatprep.mubr.msk.bf16.mxu1 %vm1962_vm2, %v1961_v0 }
0x10a6   :  { %1770 = vmatpush3.bf16.msra.mxu0 %v2069_v28  ;;  %1782 = vmatpush3.bf16.msra.mxu1 %v2033_v5 }
0x10a7   :  { %1771 = vmatprep.subr.bf16.mxu0 %v1961_v0  ;;  %1787 = vmatprep.subr.bf16.mxu1 %v1961_v0 }
0x10aa   :  { %1772 = vmatpush3.bf16.msra.mxu0 %v2076_v29 }
0x10ab   :  { %1773 = vmatprep.subr.bf16.mxu0 %v1961_v0 }
0x10ae   :  { %1774 = vmatpush3.bf16.msra.mxu0 %v2084_v31 }
0x1174   :  { %v1075_v1 = vpop.f32.mrb[24].mxu1  ;;  %v1145_v49 = vpop.f32.mrb[24].mxu0 }
0x1175   :  { %v1076_v50 = vadd.f32 %v2112_v37, %v1075_v1  ;;  %v1152_v51 = vrot.slane %v1145_v49, 4  ;;  %v1757_v52 = vpop.f32.mrb[25].mxu1  ;;  %v1765_v53 = vpop.f32.mrb[25].mxu0 }
0x1176   :  { %v1078_v54 = vpop.f32.mrb[26].mxu1  ;;  %v1148_v55 = vpop.f32.mrb[26].mxu0 }
0x1177   :  { %1916 = vtanh.f32 %v1076_v50  ;;  %v1154_v5 = vadd.f32 %v1152_v51, %v2050_v9  ;;  %v1758_v56 = vpop.f32.mrb[27].mxu1  ;;  %v1766_v57 = vpop.f32.mrb[27].mxu0  ;;  %v1550_v60 = vmul.f32 -1.442695, %v1076_v50 }
0x1179   :  { %1918 = vtanh.f32 %v1154_v5  ;;  %v1552_v61 = vmul.f32 -1.442695, %v1154_v5 }
0x117a   :  { %1920 = vpow2.f32 %v1550_v60 }
0x117b   :  { %1922 = vpow2.f32 %v1552_v61 }
0x1181   :  { %v1917_v58 = vpop.eup %1916 }
0x1182   :  { %1090 = vrot.lane.b32.xlu0 %v1917_v58, %s1964_s2 }
0x1183   :  { %v1919_v59 = vpop.eup %1918 }
0x1184   :  { %1167 = vrot.lane.b32.xlu1 %v1919_v59, %s1964_s2  ;;  %v1921_v62 = vpop.eup %1920 }
0x1185   :  { %v1923_v63 = vpop.eup %1922  ;;  %v1084_v2 = vadd.f32 1.0, %v1921_v62 }
0x1186   :  { %v1158_v3 = vadd.f32 1.0, %v1923_v63 }
0x1187   :  { %1924 = vrcp.f32 %v1084_v2 }
0x1188   :  { %1926 = vrcp.f32 %v1158_v3 }
0x1191   :  { %v1925_v4 = vpop.eup %1924 }
0x1192   :  { %v1927_v8 = vpop.eup %1926  ;;  %v1088_v13 = vmul.f32 %v1925_v4, %v2272_v30 }
0x1193   :  { %v1165_v17 = vmul.f32 %v1927_v8, %v1163_v14 }
0x11f4   :  { %v1091_v6 = vpop.permute.xlu0 %1090 }
0x11f5   :  { %v1093_v7 = vmul.f32 %v1925_v4, %v1091_v6 }
0x11f6   :  { %v1168_v10 = vpop.permute.xlu1 %1167 }
0x11f7   :  { %1095 = vrot.lane.b32.xlu0 %v1093_v7, %s1965_s3  ;;  %v1170_v12 = vmul.f32 %v1927_v8, %v1168_v10 }
0x11f9   :  { %1172 = vrot.lane.b32.xlu1 %v1170_v12, %s1965_s3 }
0x1269   :  { %v1096_v15 = vpop.permute.xlu0 %1095 }
0x126a   :  { %v2309_v16 = vadd.f32 %v1096_v15, %v1088_v13 }
0x126b   :  { %v1173_v18 = vpop.permute.xlu1 %1172 }
0x126c   :  { %1928 = vtanh.f32 %v2309_v16  ;;  %v2312_v19 = vadd.f32 %v1173_v18, %v1165_v17  ;;  %v1960_v17 = vld [vmem:[%s2379_s5] ss:$0 sm:$0xff] }
0x126e   :  { %1930 = vtanh.f32 %v2312_v19  ;;  %v1321_v56 = vrot.slane %v2312_v19, 6 }
0x1276   :  { %v1929_v20 = vpop.eup %1928 }
0x1277   :  { %1101 = vrot.lane.b32.xlu0 %v1929_v20, %s1964_s2 }
0x1278   :  { %v1931_v21 = vpop.eup %1930 }
0x1279   :  { %1178 = vrot.lane.b32.xlu1 %v1931_v21, %s1964_s2 }
0x12e9   :  { %v1102_v22 = vpop.permute.xlu0 %1101 }
0x12ea   :  { %v1104_v23 = vmul.f32 %v1925_v4, %v1102_v22 }
0x12eb   :  { %v1179_v25 = vpop.permute.xlu1 %1178 }
0x12ec   :  { %v1183_v24 = vpack.c.bf16 %v1104_v23, %v1104_v23  ;;  %v1181_v26 = vmul.f32 %v1927_v8, %v1179_v25 }
0x12ee   :  { %v1188_v30 = vrot.slane %v1183_v24, 6  ;;  %v1182_v32 = vpack.c.bf16 %v1181_v26, %v1181_v26 }
0x12f0   :  { %1189 = vrot.lane.b32.xlu1 %v1188_v30, %s1964_s2  ;;  %1185 = vrot.lane.b32.xlu0 %v1182_v32, %s1965_s3  ;;  %v1263_v33 = vrot.slane %v1182_v32, 2 }
0x12f4   :  { %1264 = vrot.lane.b32.xlu0 %v1263_v33, %s1965_s3 }
0x1362   :  { %v1190_v34 = vpop.permute.xlu1 %1189  ;;  %v1186_v35 = vpop.permute.xlu0 %1185 }
0x1363   :  { %v1193_v36 = vsel %vm158_vm3, %v1186_v35, %v1190_v34 }
0x1364   :  { %v1195_v38 = vrot.slane %v1193_v36, 2  ;;  %v1966_v36 = vmov 0.0|0.0  }
0x1365   :  { %1810 = vmatprep.subr.bf16.mxu0 %v1966_v36 }
0x1366   :  { %v1265_v39 = vpop.permute.xlu0 %1264  ;;  %1776 = vmatmul.mubr.msk.bf16.vlgmr.msra.gmra.mrb[28].mxu0 %vm263_vm4, %v1195_v38  ;;  %v47_v38 = vld [vmem:[%s2380_s6] sm:$0xff] }
0x1367   :  { %1784 = vmatmul.mubr.msk.bf16.vlgmr.msra.gmra.mrb[28].mxu1 %vm158_vm3, %v1265_v39  ;;  %1807 = vmatprep.mubr.msk.f32.mxu0 %vm1962_vm2, %v1961_v0  ;;  %v48_v39 = vld [vmem:[%s2380_s6 + $0x8] sm:$0xff] }
0x1368   :  { %1788 = vmatpush3.bf16.msra.mxu1 %v2063_v27  ;;  %1795 = vmatprep.mubr.msk.bf16.mxu1 %vm1962_vm2, %v1961_v0 }
0x1369   :  { %1789 = vmatprep.subr.bf16.mxu1 %v1961_v0 }
0x136c   :  { %1790 = vmatpush3.bf16.msra.mxu1 %v2069_v28 }
0x136d   :  { %1791 = vmatprep.subr.bf16.mxu1 %v1961_v0 }
0x1370   :  { %1792 = vmatpush3.bf16.msra.mxu1 %v2076_v29 }
0x1371   :  { %1793 = vmatprep.subr.bf16.mxu1 %v1961_v0 }
0x1374   :  { %1794 = vmatpush3.bf16.msra.mxu1 %v2084_v31 }
0x1439   :  { %v1233_v40 = vpop.f32.mrb[28].mxu0 }
0x143a   :  { %v1234_v41 = vadd.f32 %v2112_v37, %v1233_v40  ;;  %v1777_v42 = vpop.f32.mrb[29].mxu0  ;;  %v1303_v27 = vpop.f32.mrb[28].mxu1  ;;  %v49_v40 = vld [vmem:[%s2380_s6 + $0x10] sm:$0xff] }
0x143b   :  { %v1310_v43 = vrot.slane %v1303_v27, 2  ;;  %v1236_v11 = vpop.f32.mrb[30].mxu0  ;;  %v1785_v44 = vpop.f32.mrb[29].mxu1  ;;  %v50_v42 = vld [vmem:[%s2380_s6 + $0x18] sm:$0xff] }
0x143c   :  { %1932 = vtanh.f32 %v1234_v41  ;;  %v1778_v45 = vpop.f32.mrb[31].mxu0  ;;  %v1306_v46 = vpop.f32.mrb[30].mxu1  ;;  %v1554_v31 = vmul.f32 -1.442695, %v1234_v41  ;;  %v1811_v41 = vpack.c.bf16 %v48_v39, %v47_v38  ;;  %v1814_v27 = vpack.c.bf16 %v50_v42, %v49_v40 }
0x143d   :  { %v1312_v28 = vadd.f32 %v1310_v43, %v2050_v9  ;;  %v1786_v47 = vpop.f32.mrb[31].mxu1  ;;  %v13_v11 = vstv %s2381_s7 }
0x143e   :  { %1812 = vmatpush3.bf16.msra.mxu0 %v1811_v41  ;;  %14 = vst [vmem:[#allocation2] sm:$0x1] %v13_v11 }
0x143f   :  { %1934 = vtanh.f32 %v1312_v28  ;;  %v1556_v37 = vmul.f32 -1.442695, %v1312_v28  ;;  %1813 = vmatprep.subr.bf16.mxu0 %v1966_v36 }
0x1440   :  { %1936 = vpow2.f32 %v1554_v31 }
0x1441   :  { %1938 = vpow2.f32 %v1556_v37 }
0x1442   :  { %1815 = vmatpush3.bf16.msra.mxu0 %v1814_v27 }
0x1446   :  { %v1933_v29 = vpop.eup %1932 }
0x1447   :  { %1248 = vrot.lane.b32.xlu1 %v1933_v29, %s1964_s2  ;;  %v1559_v29 = vld [vmem:[#allocation2] ss:$0 sm:$0xff] }
0x1449   :  { %v1935_v0 = vpop.eup %1934 }
0x144a   :  { %1325 = vrot.lane.b32.xlu0 %v1935_v0, %s1964_s2  ;;  %v1937_v48 = vpop.eup %1936 }
0x144b   :  { %v1939_v1 = vpop.eup %1938  ;;  %v1242_v49 = vadd.f32 1.0, %v1937_v48 }
0x144c   :  { %v1316_v50 = vadd.f32 1.0, %v1939_v1 }
0x144d   :  { %1940 = vrcp.f32 %v1242_v49 }
0x144e   :  { %1942 = vrcp.f32 %v1316_v50 }
0x1457   :  { %v1941_v51 = vpop.eup %1940 }
0x1458   :  { %v1943_v53 = vpop.eup %1942  ;;  %v1246_v5 = vmul.f32 %v1941_v51, %v2309_v16 }
0x1459   :  { %v1323_v59 = vmul.f32 %v1943_v53, %v1321_v56 }
0x14b9   :  { %v1249_v9 = vpop.permute.xlu1 %1248 }
0x14ba   :  { %v1251_v52 = vmul.f32 %v1941_v51, %v1249_v9 }
0x14bc   :  { %v1326_v54 = vpop.permute.xlu0 %1325  ;;  %1253 = vrot.lane.b32.xlu1 %v1251_v52, %s1965_s3 }
0x14bd   :  { %v1328_v55 = vmul.f32 %v1943_v53, %v1326_v54 }
0x14bf   :  { %1330 = vrot.lane.b32.xlu0 %v1328_v55, %s1965_s3 }
0x152e   :  { %v1254_v57 = vpop.permute.xlu1 %1253 }
0x152f   :  { %v1256_v58 = vadd.f32 %v1254_v57, %v1246_v5 }
0x1531   :  { %1944 = vtanh.f32 %v1256_v58  ;;  %v1331_v60 = vpop.permute.xlu0 %1330 }
0x1532   :  { %v1333_v61 = vadd.f32 %v1331_v60, %v1323_v59 }
0x1534   :  { %1946 = vtanh.f32 %v1333_v61 }
0x153b   :  { %v1945_v62 = vpop.eup %1944 }
0x153c   :  { %1259 = vrot.lane.b32.xlu1 %v1945_v62, %s1964_s2 }
0x153e   :  { %v1947_v63 = vpop.eup %1946 }
0x153f   :  { %1336 = vrot.lane.b32.xlu0 %v1947_v63, %s1964_s2 }
0x15ae   :  { %v1260_v2 = vpop.permute.xlu1 %1259 }
0x15af   :  { %v1262_v3 = vmul.f32 %v1941_v51, %v1260_v2 }
0x15b1   :  { %v1341_v4 = vpack.c.bf16 %v1262_v3, %v1262_v3  ;;  %v1337_v6 = vpop.permute.xlu0 %1336 }
0x15b2   :  { %v1339_v7 = vmul.f32 %v1943_v53, %v1337_v6 }
0x15b3   :  { %v1346_v8 = vrot.slane %v1341_v4, 5 }
0x15b4   :  { %v1340_v10 = vpack.c.bf16 %v1339_v7, %v1339_v7 }
0x15b5   :  { %1347 = vrot.lane.b32.xlu0 %v1346_v8, %s1964_s2 }
0x15b6   :  { %1343 = vrot.lane.b32.xlu1 %v1340_v10, %s1965_s3 }
0x1627   :  { %v1348_v12 = vpop.permute.xlu0 %1347 }
0x1628   :  { %v1344_v13 = vpop.permute.xlu1 %1343 }
0x1629   :  { %v1351_v14 = vsel %vm158_vm3, %v1344_v13, %v1348_v12 }
0x162a   :  { %v1353_v15 = vrot.slane %v1351_v14, 3 }
0x162c   :  { %1796 = vmatmul.mubr.msk.bf16.vlgmr.msra.gmra.mrb[32].mxu1 %vm263_vm4, %v1353_v15 }
0x16ff   :  { %v1391_v16 = vpop.f32.mrb[32].mxu1 }
0x1700   :  { %v1392_v18 = vadd.f32 %v1960_v17, %v1391_v16  ;;  %v1797_v19 = vpop.f32.mrb[33].mxu1 }
0x1701   :  { %v1394_v20 = vpop.f32.mrb[34].mxu1 }
0x1702   :  { %1948 = vtanh.f32 %v1392_v18  ;;  %v1798_v21 = vpop.f32.mrb[35].mxu1  ;;  %v1558_v23 = vmul.f32 -1.442695, %v1392_v18 }
0x1704   :  { %1950 = vpow2.f32 %v1558_v23 }
0x170c   :  { %v1949_v22 = vpop.eup %1948 }
0x170d   :  { %1406 = vrot.lane.b32.xlu1 %v1949_v22, %s1964_s2 }
0x170e   :  { %v1951_v24 = vpop.eup %1950 }
0x170f   :  { %v1400_v25 = vadd.f32 1.0, %v1951_v24 }
0x1711   :  { %1952 = vrcp.f32 %v1400_v25 }
0x171b   :  { %v1953_v26 = vpop.eup %1952 }
0x171c   :  { %v1404_v33 = vmul.f32 %v1953_v26, %v1256_v58 }
0x177f   :  { %v1407_v30 = vpop.permute.xlu1 %1406 }
0x1780   :  { %v1409_v32 = vmul.f32 %v1953_v26, %v1407_v30 }
0x1782   :  { %1411 = vrot.lane.b32.xlu0 %v1409_v32, %s1965_s3 }
0x17f4   :  { %v1412_v34 = vpop.permute.xlu0 %1411 }
0x17f5   :  { %v1414_v35 = vadd.f32 %v1412_v34, %v1404_v33 }
0x17f7   :  { %1954 = vtanh.f32 %v1414_v35 }
0x1801   :  { %v1955_v43 = vpop.eup %1954 }
0x1802   :  { %1417 = vrot.lane.b32.xlu1 %v1955_v43, %s1964_s2 }
0x1874   :  { %v1418_v44 = vpop.permute.xlu1 %1417 }
0x1875   :  { %v1420_v45 = vmul.f32 %v1953_v26, %v1418_v44 }
0x1877   :  { %v1422_v46 = vmul.f32 0.01, %v1420_v45  ;;  %vm1421_vm5 = vcmp.ge.f32.partialorder %v1420_v45, 0.0 }
0x1879   :  { %v1423_v28 = vsel %vm1421_vm5, %v1420_v45, %v1422_v46 }
0x187a   :  { %1431 = vrot.lane.b32.xlu0 %v1423_v28, %s1965_s3 }
0x18ec   :  { %v1432_v47 = vpop.permute.xlu0 %1431 }
0x18ed   :  { %1808 = vmatmul.mubr.msk.f32.vlgmr.msra.gmra.mrb[32].mxu0 %vm158_vm3, %v1432_v47 }
0x19c0   :  { %v1501_v0 = vpop.f32.mrb[32].mxu0 }
0x19c1   :  { %v1502_v31 = vadd.f32 %v1559_v29, %v1501_v0  ;;  %v1809_v37 = vpop.f32.mrb[33].mxu0 }
0x19c3   :  { %v1561_v48 = vmul.f32 -1.442695, %v1502_v31 }
0x19c5   :  { %1956 = vpow2.f32 %v1561_v48 }
0x19cf   :  { %v1957_v1 = vpop.eup %1956 }
0x19d0   :  { %v1508_v49 = vadd.f32 1.0, %v1957_v1 }
0x19d2   :  { %1958 = vrcp.f32 %v1508_v49 }
0x19dc   :  { %v1959_v50 = vpop.eup %1958 }
0x19dd   :  { %1512 = vst.msk [vmem:[%s2382_s8] sm:$0x3] %vm1511_vm6, %v1959_v50 }

</bundles_post_ra>
